<compile_context>
chip_gen: v5e
topology: v5e:2x2
jax: 0.10.0
libtpu: 0.0.40
codegen_flags: <defaults>
</compile_context>

<pallas_src>
import math
import functools

import jax
import jax.numpy as jnp
from jax.experimental import pallas as pl
from jax.experimental.pallas import tpu as pltpu

EPS = 1e-5  # nn.InstanceNorm2d default eps


def _round_up(x, m):
    return ((x + m - 1) // m) * m


def resblocks_kernel(xpf_ref, w_ref, b_ref, out_ref, xcur_ref, y1p_ref, acc_ref,
                     *, h, w, c, p, nout, org, n_blocks):
    """One grid step = one ResBlock applied to one image.

    xpf_ref : (1, C, NPAD) zero-padded image, flat pixels on lanes, interior at lane BASE
    w_ref   : (1, 2, C, 9C) per-block conv weights, lhs layout out = W @ patches
    b_ref   : (1, 2, C, 1)  per-block biases
    out_ref : (1, C, NOUT)  final activation, flat (H rows x (W+2)-pitch) layout, lane-dense
    xcur_ref: (C, NPAD)     VMEM scratch: carried (padded) activation across ResBlocks
    y1p_ref : (C, NPAD)     VMEM scratch: re-padded intermediate (never hits HBM)
    acc_ref : (C, NOUT)     VMEM scratch: conv accumulator
    """
    k = pl.program_id(1)                       # ResBlock index (sequential / "arbitrary")
    hp = h * p
    base = org + p + 1                         # lane-aligned start of the image interior
    inv_hw = 1.0 / float(h * w)

    # Valid-pixel mask along the lane (pixel) axis, built in-kernel.
    # col = lane % p computed with float ops only: the +0.5 keeps the true quotient at
    # least 0.5/p away from every integer, far above f32 rounding error, so floor is exact.
    lane_i = jax.lax.broadcasted_iota(jnp.int32, (1, nout), 1)
    lane_f = lane_i.astype(jnp.float32)
    row_f = jnp.floor((lane_f + 0.5) / float(p))
    col_f = lane_f - row_f * float(p)
    maskf = jnp.where((col_f < float(w)) & (lane_i < hp), 1.0, 0.0)

    # First ResBlock of this image: load the padded input into the carried-activation
    # scratch and zero the re-pad scratch once (its borders are never written afterwards).
    @pl.when(k == 0)
    def _():
        xcur_ref[...] = xpf_ref[0]
        y1p_ref[...] = jnp.zeros_like(y1p_ref)

    offs = [org + dy * p + dx for dy in range(3) for dx in range(3)]

    def conv3x3(src_ref, wk, bk, center=None):
        # 9 shifted lane windows, each contracted over C_in on the MXU; accumulation goes
        # through a VMEM scratch (`acc_ref[...] +=`, MRB-friendly on v7x).
        acc_ref[...] = jnp.zeros_like(acc_ref)
        for t, off in enumerate(offs):
            tap = center if (t == 4 and center is not None) \
                else src_ref[:, off:off + nout]
            acc_ref[...] += jnp.dot(wk[:, t * c:(t + 1) * c], tap,
                                    preferred_element_type=jnp.float32)
        return acc_ref[...] + bk

    def instance_norm(x):
        # Two-pass per-channel stats over the H*W valid pixels only (wrap columns masked).
        mean = jnp.sum(x * maskf, axis=1, keepdims=True) * inv_hw
        d = x - mean
        var = jnp.sum(d * d * maskf, axis=1, keepdims=True) * inv_hw
        return d * jax.lax.rsqrt(var + EPS)

    # Centre tap of conv1 doubles as the residual read (hoisted, loaded once, aligned).
    center = xcur_ref[:, base:base + nout]

    # ---- Conv2dBlock 1: conv3x3 -> InstanceNorm -> ReLU ----
    y1 = jnp.maximum(
        instance_norm(conv3x3(xcur_ref, w_ref[0, 0], b_ref[0, 0], center)), 0.0)
    # Re-pad inside VMEM: the wrap/junk columns are zeroed so they act as the zero padding
    # of the second conv; the borders of y1p stay zero from the one-time init.
    y1p_ref[:, base:base + nout] = y1 * maskf

    # ---- Conv2dBlock 2: conv3x3 -> InstanceNorm (no activation), then residual add ----
    y2 = instance_norm(conv3x3(y1p_ref, w_ref[0, 1], b_ref[0, 1]))
    res_out = y2 + center

    # Carry to the next ResBlock (masked so the wrap columns remain valid zero padding).
    xcur_ref[:, base:base + nout] = res_out * maskf

    # Only the final ResBlock's activation ever goes back to HBM (lane-dense full-tile store).
    @pl.when(k == n_blocks - 1)
    def _():
        out_ref[0] = res_out


def resblocks_forward(x_nchw, params):
    """ResBlocks forward. x_nchw: (B, C, H, W). params: list of (w1, b1, w2, b2) per block,
    with w*: (3, 3, C, C) HWIO and b*: (C,)."""
    x = x_nchw.astype(jnp.float32)
    B, C, H, W = x.shape
    nb = len(params)

    P = W + 2                               # row pitch of the flat padded image
    HP = H * P                              # flat output length (incl. 2 wrap cols / row)
    NOUT = _round_up(HP, 128)               # lane-dense accumulator / output width
    ORG = (-(P + 1)) % 128                  # left margin: image interior starts lane-aligned
    NPAD = _round_up(ORG + max((H + 2) * P, 2 * P + 2 + NOUT), 128)

    # One-time pack: NCHW -> zero-padded -> flat (B, C, NPAD).  No per-block wrapper glue.
    xp = jnp.pad(x, ((0, 0), (0, 0), (1, 1), (1, 1))).reshape(B, C, (H + 2) * P)
    xpf = jnp.pad(xp, ((0, 0), (0, 0), (ORG, NPAD - ORG - (H + 2) * P)))

    # Stack per-block weights as the matmul lhs (out = W @ patches): (nb, 2, C_out, 9*C_in),
    # and biases as (nb, 2, C, 1) column vectors (broadcast along the lane/pixel axis).
    wk = jnp.stack([jnp.stack([w1.reshape(9 * C, C).T, w2.reshape(9 * C, C).T])
                    for (w1, _, w2, _) in params]).astype(jnp.float32)
    bk = jnp.stack([jnp.stack([b1.reshape(C, 1), b2.reshape(C, 1)])
                    for (_, b1, _, b2) in params]).astype(jnp.float32)

    out_flat = pl.pallas_call(
        functools.partial(resblocks_kernel, h=H, w=W, c=C, p=P,
                          nout=NOUT, org=ORG, n_blocks=nb),
        out_shape=jax.ShapeDtypeStruct((B, C, NOUT), jnp.float32),
        grid_spec=pltpu.PrefetchScalarGridSpec(
            num_scalar_prefetch=0,
            grid=(B, nb),
            in_specs=[
                pl.BlockSpec((1, C, NPAD), lambda b, k: (b, 0, 0)),         # padded image
                pl.BlockSpec((1, 2, C, 9 * C), lambda b, k: (k, 0, 0, 0)),  # block-k weights
                pl.BlockSpec((1, 2, C, 1), lambda b, k: (k, 0, 0, 0)),      # block-k biases
            ],
            out_specs=pl.BlockSpec((1, C, NOUT), lambda b, k: (b, 0, 0)),
            scratch_shapes=[
                pltpu.VMEM((C, NPAD), jnp.float32),   # carried (padded) activation
                pltpu.VMEM((C, NPAD), jnp.float32),   # re-padded intermediate y1
                pltpu.VMEM((C, NOUT), jnp.float32),   # conv accumulator
            ],
        ),
        compiler_params=pltpu.CompilerParams(
            dimension_semantics=("parallel", "arbitrary"),
            vmem_limit_bytes=64 * 1024 * 1024),
    )(xpf, wk, bk)

    # Single final un-pad: drop the wrap columns and restore (B, C, H, W).  Channels-first
    # is kept end to end, so there is no transpose glue at all.
    return out_flat[:, :, :HP].reshape(B, C, H, P)[:, :, :, :W]


# ---------------- pure-JAX reference for verification ----------------
def _ref_instance_norm(y):
    m = jnp.mean(y, axis=(1, 2), keepdims=True)
    v = jnp.mean((y - m) ** 2, axis=(1, 2), keepdims=True)
    return (y - m) * jax.lax.rsqrt(v + EPS)


def resblocks_reference(x_nchw, params):
    x = jnp.transpose(x_nchw, (0, 2, 3, 1)).astype(jnp.float32)

    def conv(inp, w, b):
        y = jax.lax.conv_general_dilated(
            inp, w, window_strides=(1, 1), padding=((1, 1), (1, 1)),
            dimension_numbers=("NHWC", "HWIO", "NHWC"),
            precision=jax.lax.Precision.HIGHEST)
        return y + b

    for (w1, b1, w2, b2) in params:
        y = jnp.maximum(_ref_instance_norm(conv(x, w1, b1)), 0.0)
        y = _ref_instance_norm(conv(y, w2, b2))
        x = y + x
    return jnp.transpose(x, (0, 3, 1, 2))


if __name__ == "__main__":
    # ResBlocks(num_blocks=2, dim=4, norm='in', activation='relu', pad_type='zero')
    B, C, H, W = 2, 4, 16, 16
    NUM_BLOCKS = 2

    key = jax.random.PRNGKey(0)
    keys = jax.random.split(key, 4 * NUM_BLOCKS + 1)

    fan_in = C * 3 * 3
    bound = 1.0 / math.sqrt(fan_in)
    params = []
    for i in range(NUM_BLOCKS):
        k1, k2, k3, k4 = keys[4 * i:4 * i + 4]
        params.append((
            jax.random.uniform(k1, (3, 3, C, C), jnp.float32, -bound, bound),
            jax.random.uniform(k2, (C,), jnp.float32, -bound, bound),
            jax.random.uniform(k3, (3, 3, C, C), jnp.float32, -bound, bound),
            jax.random.uniform(k4, (C,), jnp.float32, -bound, bound),
        ))
    x = jax.random.normal(keys[-1], (B, C, H, W), jnp.float32)

    fwd = jax.jit(resblocks_forward)
    out = jax.block_until_ready(fwd(x, params))
    ref = jax.block_until_ready(resblocks_reference(x, params))

    assert out.shape == (B, C, H, W)
    err = float(jnp.max(jnp.abs(out - ref)))
    assert jnp.allclose(out, ref, rtol=2e-4, atol=2e-4), f"max abs err = {err}"
    print("KERNEL_OK")
</pallas_src>

<mosaic_0001>
module attributes {stable_mosaic.version = 11 : i64} {
  func.func @resblocks_kernel(%arg0: i32, %arg1: i32, %arg2: memref<1x4x640xf32, #tpu.memory_space<vmem>>, %arg3: memref<1x2x4x36xf32, #tpu.memory_space<vmem>>, %arg4: memref<1x2x4x1xf32, #tpu.memory_space<vmem>>, %arg5: memref<1x4x384xf32, #tpu.memory_space<vmem>>, %arg6: memref<4x640xf32, #tpu.memory_space<vmem>>, %arg7: memref<4x640xf32, #tpu.memory_space<vmem>>, %arg8: memref<4x384xf32, #tpu.memory_space<vmem>>) attributes {dimension_semantics = [#tpu.dimension_semantics<parallel>, #tpu.dimension_semantics<arbitrary>], iteration_bounds = array<i64: 2, 2>, scalar_prefetch = 0 : i64, scratch_operands = 3 : i64, tpu.core_type = #tpu.core_type<tc>, window_params = [{transform_indices = @transform_0, window_bounds = array<i64: 1, 4, 640>}, {transform_indices = @transform_1, window_bounds = array<i64: 1, 2, 4, 36>}, {transform_indices = @transform_2, window_bounds = array<i64: 1, 2, 4, 1>}, {transform_indices = @transform_3, window_bounds = array<i64: 1, 4, 384>}]} {
    %0 = tpu.iota {dimensions = array<i32: 1>} : vector<1x384xi32>
    %1 = arith.sitofp %0 : vector<1x384xi32> to vector<1x384xf32>
    %cst = arith.constant 5.000000e-01 : f32
    %2 = vector.broadcast %cst : f32 to vector<1x384xf32>
    %3 = arith.addf %1, %2 : vector<1x384xf32>
    %cst_0 = arith.constant 1.800000e+01 : f32
    %4 = vector.broadcast %cst_0 : f32 to vector<1x384xf32>
    %5 = arith.divf %3, %4 : vector<1x384xf32>
    %6 = math.floor %5 : vector<1x384xf32>
    %cst_1 = arith.constant 1.800000e+01 : f32
    %7 = vector.broadcast %cst_1 : f32 to vector<1x384xf32>
    %8 = arith.mulf %6, %7 : vector<1x384xf32>
    %9 = arith.subf %1, %8 : vector<1x384xf32>
    %cst_2 = arith.constant 1.600000e+01 : f32
    %10 = vector.broadcast %cst_2 : f32 to vector<1x384xf32>
    %11 = arith.cmpf olt, %9, %10 : vector<1x384xf32>
    %c288_i32 = arith.constant 288 : i32
    %12 = vector.broadcast %c288_i32 : i32 to vector<1x384xi32>
    %13 = arith.cmpi slt, %0, %12 : vector<1x384xi32>
    %14 = arith.andi %11, %13 : vector<1x384xi1>
    %cst_3 = arith.constant 1.000000e+00 : f32
    %cst_4 = arith.constant 0.000000e+00 : f32
    %15 = vector.broadcast %cst_3 : f32 to vector<1x384xf32>
    %16 = vector.broadcast %cst_4 : f32 to vector<1x384xf32>
    %17 = arith.select %14, %15, %16 : vector<1x384xi1>, vector<1x384xf32>
    %c0_i32 = arith.constant 0 : i32
    %18 = arith.cmpi eq, %arg1, %c0_i32 : i32
    %19 = arith.extui %18 : i1 to i32
    %c0_i32_5 = arith.constant 0 : i32
    %20 = arith.cmpi ne, %19, %c0_i32_5 : i32
    scf.if %20 {
      %c0_163 = arith.constant 0 : index
      %c0_164 = arith.constant 0 : index
      %c0_165 = arith.constant 0 : index
      %199 = vector.load %arg2[%c0_163, %c0_164, %c0_165] : memref<1x4x640xf32, #tpu.memory_space<vmem>>, vector<1x4x640xf32>
      %200 = vector.shape_cast %199 : vector<1x4x640xf32> to vector<4x640xf32>
      %c0_166 = arith.constant 0 : index
      %c0_167 = arith.constant 0 : index
      %201 = vector.load %arg6[%c0_166, %c0_167] : memref<4x640xf32, #tpu.memory_space<vmem>>, vector<4x640xf32>
      tpu.vector_store %arg6[%c0_166, %c0_167], %200 {strides = array<i32>} : memref<4x640xf32, #tpu.memory_space<vmem>>, vector<4x640xf32>,
      %cst_168 = arith.constant 0.000000e+00 : f32
      %202 = vector.broadcast %cst_168 : f32 to vector<4x640xf32>
      %c0_169 = arith.constant 0 : index
      %c0_170 = arith.constant 0 : index
      %203 = vector.load %arg7[%c0_169, %c0_170] : memref<4x640xf32, #tpu.memory_space<vmem>>, vector<4x640xf32>
      tpu.vector_store %arg7[%c0_169, %c0_170], %202 {strides = array<i32>} : memref<4x640xf32, #tpu.memory_space<vmem>>, vector<4x640xf32>,
    } else {
    }
    %c0 = arith.constant 0 : index
    %c128 = arith.constant 128 : index
    %21 = vector.load %arg6[%c0, %c128] : memref<4x640xf32, #tpu.memory_space<vmem>>, vector<4x384xf32>
    %c0_6 = arith.constant 0 : index
    %c0_7 = arith.constant 0 : index
    %c0_8 = arith.constant 0 : index
    %c0_9 = arith.constant 0 : index
    %22 = vector.load %arg3[%c0_6, %c0_7, %c0_8, %c0_9] : memref<1x2x4x36xf32, #tpu.memory_space<vmem>>, vector<1x1x4x36xf32>
    %23 = vector.shape_cast %22 : vector<1x1x4x36xf32> to vector<4x36xf32>
    %c0_10 = arith.constant 0 : index
    %c0_11 = arith.constant 0 : index
    %c0_12 = arith.constant 0 : index
    %c0_13 = arith.constant 0 : index
    %24 = vector.load %arg4[%c0_10, %c0_11, %c0_12, %c0_13] : memref<1x2x4x1xf32, #tpu.memory_space<vmem>>, vector<1x1x4x1xf32>
    %25 = vector.shape_cast %24 : vector<1x1x4x1xf32> to vector<4x1xf32>
    %cst_14 = arith.constant 0.000000e+00 : f32
    %26 = vector.broadcast %cst_14 : f32 to vector<4x384xf32>
    %c0_15 = arith.constant 0 : index
    %c0_16 = arith.constant 0 : index
    %27 = vector.load %arg8[%c0_15, %c0_16] : memref<4x384xf32, #tpu.memory_space<vmem>>, vector<4x384xf32>
    tpu.vector_store %arg8[%c0_15, %c0_16], %26 {strides = array<i32>} : memref<4x384xf32, #tpu.memory_space<vmem>>, vector<4x384xf32>,
    %c0_17 = arith.constant 0 : index
    %c109 = arith.constant 109 : index
    %28 = vector.load %arg6[%c0_17, %c109] : memref<4x640xf32, #tpu.memory_space<vmem>>, vector<4x384xf32>
    %c0_18 = arith.constant 0 : index
    %c0_19 = arith.constant 0 : index
    %29 = vector.load %arg8[%c0_18, %c0_19] : memref<4x384xf32, #tpu.memory_space<vmem>>, vector<4x384xf32>
    %30 = vector.extract_strided_slice %23 {offsets = [0, 0], sizes = [4, 4], strides = [1, 1]} : vector<4x36xf32> to vector<4x4xf32>
    %cst_20 = arith.constant dense<0.000000e+00> : vector<4x384xf32>
    %31 = tpu.matmul %30, %28, %cst_20 {dimension_numbers = #tpu.dot_dimension_numbers<[1], [0], [0], [1], [0, 0, 1, 1], [], []>} : vector<4x4xf32>, vector<4x384xf32>, vector<4x384xf32> -> vector<4x384xf32>
    %32 = arith.addf %29, %31 : vector<4x384xf32>
    %c0_21 = arith.constant 0 : index
    %c0_22 = arith.constant 0 : index
    %33 = vector.load %arg8[%c0_21, %c0_22] : memref<4x384xf32, #tpu.memory_space<vmem>>, vector<4x384xf32>
    tpu.vector_store %arg8[%c0_21, %c0_22], %32 {strides = array<i32>} : memref<4x384xf32, #tpu.memory_space<vmem>>, vector<4x384xf32>,
    %c0_23 = arith.constant 0 : index
    %c110 = arith.constant 110 : index
    %34 = vector.load %arg6[%c0_23, %c110] : memref<4x640xf32, #tpu.memory_space<vmem>>, vector<4x384xf32>
    %c0_24 = arith.constant 0 : index
    %c0_25 = arith.constant 0 : index
    %35 = vector.load %arg8[%c0_24, %c0_25] : memref<4x384xf32, #tpu.memory_space<vmem>>, vector<4x384xf32>
    %36 = vector.extract_strided_slice %23 {offsets = [0, 4], sizes = [4, 4], strides = [1, 1]} : vector<4x36xf32> to vector<4x4xf32>
    %cst_26 = arith.constant dense<0.000000e+00> : vector<4x384xf32>
    %37 = tpu.matmul %36, %34, %cst_26 {dimension_numbers = #tpu.dot_dimension_numbers<[1], [0], [0], [1], [0, 0, 1, 1], [], []>} : vector<4x4xf32>, vector<4x384xf32>, vector<4x384xf32> -> vector<4x384xf32>
    %38 = arith.addf %35, %37 : vector<4x384xf32>
    %c0_27 = arith.constant 0 : index
    %c0_28 = arith.constant 0 : index
    %39 = vector.load %arg8[%c0_27, %c0_28] : memref<4x384xf32, #tpu.memory_space<vmem>>, vector<4x384xf32>
    tpu.vector_store %arg8[%c0_27, %c0_28], %38 {strides = array<i32>} : memref<4x384xf32, #tpu.memory_space<vmem>>, vector<4x384xf32>,
    %c0_29 = arith.constant 0 : index
    %c111 = arith.constant 111 : index
    %40 = vector.load %arg6[%c0_29, %c111] : memref<4x640xf32, #tpu.memory_space<vmem>>, vector<4x384xf32>
    %c0_30 = arith.constant 0 : index
    %c0_31 = arith.constant 0 : index
    %41 = vector.load %arg8[%c0_30, %c0_31] : memref<4x384xf32, #tpu.memory_space<vmem>>, vector<4x384xf32>
    %42 = vector.extract_strided_slice %23 {offsets = [0, 8], sizes = [4, 4], strides = [1, 1]} : vector<4x36xf32> to vector<4x4xf32>
    %cst_32 = arith.constant dense<0.000000e+00> : vector<4x384xf32>
    %43 = tpu.matmul %42, %40, %cst_32 {dimension_numbers = #tpu.dot_dimension_numbers<[1], [0], [0], [1], [0, 0, 1, 1], [], []>} : vector<4x4xf32>, vector<4x384xf32>, vector<4x384xf32> -> vector<4x384xf32>
    %44 = arith.addf %41, %43 : vector<4x384xf32>
    %c0_33 = arith.constant 0 : index
    %c0_34 = arith.constant 0 : index
    %45 = vector.load %arg8[%c0_33, %c0_34] : memref<4x384xf32, #tpu.memory_space<vmem>>, vector<4x384xf32>
    tpu.vector_store %arg8[%c0_33, %c0_34], %44 {strides = array<i32>} : memref<4x384xf32, #tpu.memory_space<vmem>>, vector<4x384xf32>,
    %c0_35 = arith.constant 0 : index
    %c127 = arith.constant 127 : index
    %46 = vector.load %arg6[%c0_35, %c127] : memref<4x640xf32, #tpu.memory_space<vmem>>, vector<4x384xf32>
    %c0_36 = arith.constant 0 : index
    %c0_37 = arith.constant 0 : index
    %47 = vector.load %arg8[%c0_36, %c0_37] : memref<4x384xf32, #tpu.memory_space<vmem>>, vector<4x384xf32>
    %48 = vector.extract_strided_slice %23 {offsets = [0, 12], sizes = [4, 4], strides = [1, 1]} : vector<4x36xf32> to vector<4x4xf32>
    %cst_38 = arith.constant dense<0.000000e+00> : vector<4x384xf32>
    %49 = tpu.matmul %48, %46, %cst_38 {dimension_numbers = #tpu.dot_dimension_numbers<[1], [0], [0], [1], [0, 0, 1, 1], [], []>} : vector<4x4xf32>, vector<4x384xf32>, vector<4x384xf32> -> vector<4x384xf32>
    %50 = arith.addf %47, %49 : vector<4x384xf32>
    %c0_39 = arith.constant 0 : index
    %c0_40 = arith.constant 0 : index
    %51 = vector.load %arg8[%c0_39, %c0_40] : memref<4x384xf32, #tpu.memory_space<vmem>>, vector<4x384xf32>
    tpu.vector_store %arg8[%c0_39, %c0_40], %50 {strides = array<i32>} : memref<4x384xf32, #tpu.memory_space<vmem>>, vector<4x384xf32>,
    %c0_41 = arith.constant 0 : index
    %c0_42 = arith.constant 0 : index
    %52 = vector.load %arg8[%c0_41, %c0_42] : memref<4x384xf32, #tpu.memory_space<vmem>>, vector<4x384xf32>
    %53 = vector.extract_strided_slice %23 {offsets = [0, 16], sizes = [4, 4], strides = [1, 1]} : vector<4x36xf32> to vector<4x4xf32>
    %cst_43 = arith.constant dense<0.000000e+00> : vector<4x384xf32>
    %54 = tpu.matmul %53, %21, %cst_43 {dimension_numbers = #tpu.dot_dimension_numbers<[1], [0], [0], [1], [0, 0, 1, 1], [], []>} : vector<4x4xf32>, vector<4x384xf32>, vector<4x384xf32> -> vector<4x384xf32>
    %55 = arith.addf %52, %54 : vector<4x384xf32>
    %c0_44 = arith.constant 0 : index
    %c0_45 = arith.constant 0 : index
    %56 = vector.load %arg8[%c0_44, %c0_45] : memref<4x384xf32, #tpu.memory_space<vmem>>, vector<4x384xf32>
    tpu.vector_store %arg8[%c0_44, %c0_45], %55 {strides = array<i32>} : memref<4x384xf32, #tpu.memory_space<vmem>>, vector<4x384xf32>,
    %c0_46 = arith.constant 0 : index
    %c129 = arith.constant 129 : index
    %57 = vector.load %arg6[%c0_46, %c129] : memref<4x640xf32, #tpu.memory_space<vmem>>, vector<4x384xf32>
    %c0_47 = arith.constant 0 : index
    %c0_48 = arith.constant 0 : index
    %58 = vector.load %arg8[%c0_47, %c0_48] : memref<4x384xf32, #tpu.memory_space<vmem>>, vector<4x384xf32>
    %59 = vector.extract_strided_slice %23 {offsets = [0, 20], sizes = [4, 4], strides = [1, 1]} : vector<4x36xf32> to vector<4x4xf32>
    %cst_49 = arith.constant dense<0.000000e+00> : vector<4x384xf32>
    %60 = tpu.matmul %59, %57, %cst_49 {dimension_numbers = #tpu.dot_dimension_numbers<[1], [0], [0], [1], [0, 0, 1, 1], [], []>} : vector<4x4xf32>, vector<4x384xf32>, vector<4x384xf32> -> vector<4x384xf32>
    %61 = arith.addf %58, %60 : vector<4x384xf32>
    %c0_50 = arith.constant 0 : index
    %c0_51 = arith.constant 0 : index
    %62 = vector.load %arg8[%c0_50, %c0_51] : memref<4x384xf32, #tpu.memory_space<vmem>>, vector<4x384xf32>
    tpu.vector_store %arg8[%c0_50, %c0_51], %61 {strides = array<i32>} : memref<4x384xf32, #tpu.memory_space<vmem>>, vector<4x384xf32>,
    %c0_52 = arith.constant 0 : index
    %c145 = arith.constant 145 : index
    %63 = vector.load %arg6[%c0_52, %c145] : memref<4x640xf32, #tpu.memory_space<vmem>>, vector<4x384xf32>
    %c0_53 = arith.constant 0 : index
    %c0_54 = arith.constant 0 : index
    %64 = vector.load %arg8[%c0_53, %c0_54] : memref<4x384xf32, #tpu.memory_space<vmem>>, vector<4x384xf32>
    %65 = vector.extract_strided_slice %23 {offsets = [0, 24], sizes = [4, 4], strides = [1, 1]} : vector<4x36xf32> to vector<4x4xf32>
    %cst_55 = arith.constant dense<0.000000e+00> : vector<4x384xf32>
    %66 = tpu.matmul %65, %63, %cst_55 {dimension_numbers = #tpu.dot_dimension_numbers<[1], [0], [0], [1], [0, 0, 1, 1], [], []>} : vector<4x4xf32>, vector<4x384xf32>, vector<4x384xf32> -> vector<4x384xf32>
    %67 = arith.addf %64, %66 : vector<4x384xf32>
    %c0_56 = arith.constant 0 : index
    %c0_57 = arith.constant 0 : index
    %68 = vector.load %arg8[%c0_56, %c0_57] : memref<4x384xf32, #tpu.memory_space<vmem>>, vector<4x384xf32>
    tpu.vector_store %arg8[%c0_56, %c0_57], %67 {strides = array<i32>} : memref<4x384xf32, #tpu.memory_space<vmem>>, vector<4x384xf32>,
    %c0_58 = arith.constant 0 : index
    %c146 = arith.constant 146 : index
    %69 = vector.load %arg6[%c0_58, %c146] : memref<4x640xf32, #tpu.memory_space<vmem>>, vector<4x384xf32>
    %c0_59 = arith.constant 0 : index
    %c0_60 = arith.constant 0 : index
    %70 = vector.load %arg8[%c0_59, %c0_60] : memref<4x384xf32, #tpu.memory_space<vmem>>, vector<4x384xf32>
    %71 = vector.extract_strided_slice %23 {offsets = [0, 28], sizes = [4, 4], strides = [1, 1]} : vector<4x36xf32> to vector<4x4xf32>
    %cst_61 = arith.constant dense<0.000000e+00> : vector<4x384xf32>
    %72 = tpu.matmul %71, %69, %cst_61 {dimension_numbers = #tpu.dot_dimension_numbers<[1], [0], [0], [1], [0, 0, 1, 1], [], []>} : vector<4x4xf32>, vector<4x384xf32>, vector<4x384xf32> -> vector<4x384xf32>
    %73 = arith.addf %70, %72 : vector<4x384xf32>
    %c0_62 = arith.constant 0 : index
    %c0_63 = arith.constant 0 : index
    %74 = vector.load %arg8[%c0_62, %c0_63] : memref<4x384xf32, #tpu.memory_space<vmem>>, vector<4x384xf32>
    tpu.vector_store %arg8[%c0_62, %c0_63], %73 {strides = array<i32>} : memref<4x384xf32, #tpu.memory_space<vmem>>, vector<4x384xf32>,
    %c0_64 = arith.constant 0 : index
    %c147 = arith.constant 147 : index
    %75 = vector.load %arg6[%c0_64, %c147] : memref<4x640xf32, #tpu.memory_space<vmem>>, vector<4x384xf32>
    %c0_65 = arith.constant 0 : index
    %c0_66 = arith.constant 0 : index
    %76 = vector.load %arg8[%c0_65, %c0_66] : memref<4x384xf32, #tpu.memory_space<vmem>>, vector<4x384xf32>
    %77 = vector.extract_strided_slice %23 {offsets = [0, 32], sizes = [4, 4], strides = [1, 1]} : vector<4x36xf32> to vector<4x4xf32>
    %cst_67 = arith.constant dense<0.000000e+00> : vector<4x384xf32>
    %78 = tpu.matmul %77, %75, %cst_67 {dimension_numbers = #tpu.dot_dimension_numbers<[1], [0], [0], [1], [0, 0, 1, 1], [], []>} : vector<4x4xf32>, vector<4x384xf32>, vector<4x384xf32> -> vector<4x384xf32>
    %79 = arith.addf %76, %78 : vector<4x384xf32>
    %c0_68 = arith.constant 0 : index
    %c0_69 = arith.constant 0 : index
    %80 = vector.load %arg8[%c0_68, %c0_69] : memref<4x384xf32, #tpu.memory_space<vmem>>, vector<4x384xf32>
    tpu.vector_store %arg8[%c0_68, %c0_69], %79 {strides = array<i32>} : memref<4x384xf32, #tpu.memory_space<vmem>>, vector<4x384xf32>,
    %c0_70 = arith.constant 0 : index
    %c0_71 = arith.constant 0 : index
    %81 = vector.load %arg8[%c0_70, %c0_71] : memref<4x384xf32, #tpu.memory_space<vmem>>, vector<4x384xf32>
    %82 = vector.broadcast %25 : vector<4x1xf32> to vector<4x384xf32>
    %83 = arith.addf %81, %82 : vector<4x384xf32>
    %84 = vector.broadcast %17 : vector<1x384xf32> to vector<4x384xf32>
    %85 = arith.mulf %83, %84 : vector<4x384xf32>
    %cst_72 = arith.constant dense<0.000000e+00> : vector<4xf32>
    %86 = vector.multi_reduction <add>, %85, %cst_72 [1] : vector<4x384xf32> to vector<4xf32>
    %87 = vector.shape_cast %86 : vector<4xf32> to vector<4x1xf32>
    %cst_73 = arith.constant 3.906250e-03 : f32
    %88 = vector.broadcast %cst_73 : f32 to vector<4x1xf32>
    %89 = arith.mulf %87, %88 : vector<4x1xf32>
    %90 = vector.broadcast %89 : vector<4x1xf32> to vector<4x384xf32>
    %91 = arith.subf %83, %90 : vector<4x384xf32>
    %92 = arith.mulf %91, %91 : vector<4x384xf32>
    %93 = vector.broadcast %17 : vector<1x384xf32> to vector<4x384xf32>
    %94 = arith.mulf %92, %93 : vector<4x384xf32>
    %cst_74 = arith.constant dense<0.000000e+00> : vector<4xf32>
    %95 = vector.multi_reduction <add>, %94, %cst_74 [1] : vector<4x384xf32> to vector<4xf32>
    %96 = vector.shape_cast %95 : vector<4xf32> to vector<4x1xf32>
    %cst_75 = arith.constant 3.906250e-03 : f32
    %97 = vector.broadcast %cst_75 : f32 to vector<4x1xf32>
    %98 = arith.mulf %96, %97 : vector<4x1xf32>
    %cst_76 = arith.constant 9.99999974E-6 : f32
    %99 = vector.broadcast %cst_76 : f32 to vector<4x1xf32>
    %100 = arith.addf %98, %99 : vector<4x1xf32>
    %101 = math.rsqrt %100 : vector<4x1xf32>
    %102 = vector.broadcast %101 : vector<4x1xf32> to vector<4x384xf32>
    %103 = arith.mulf %91, %102 : vector<4x384xf32>
    %cst_77 = arith.constant 0.000000e+00 : f32
    %104 = vector.broadcast %cst_77 : f32 to vector<4x384xf32>
    %105 = arith.maximumf %103, %104 : vector<4x384xf32>
    %106 = vector.broadcast %17 : vector<1x384xf32> to vector<4x384xf32>
    %107 = arith.mulf %105, %106 : vector<4x384xf32>
    %c0_78 = arith.constant 0 : index
    %c128_79 = arith.constant 128 : index
    %108 = vector.load %arg7[%c0_78, %c128_79] : memref<4x640xf32, #tpu.memory_space<vmem>>, vector<4x384xf32>
    tpu.vector_store %arg7[%c0_78, %c128_79], %107 {strides = array<i32>} : memref<4x640xf32, #tpu.memory_space<vmem>>, vector<4x384xf32>,
    %c0_80 = arith.constant 0 : index
    %c1 = arith.constant 1 : index
    %c0_81 = arith.constant 0 : index
    %c0_82 = arith.constant 0 : index
    %109 = vector.load %arg3[%c0_80, %c1, %c0_81, %c0_82] : memref<1x2x4x36xf32, #tpu.memory_space<vmem>>, vector<1x1x4x36xf32>
    %110 = vector.shape_cast %109 : vector<1x1x4x36xf32> to vector<4x36xf32>
    %c0_83 = arith.constant 0 : index
    %c1_84 = arith.constant 1 : index
    %c0_85 = arith.constant 0 : index
    %c0_86 = arith.constant 0 : index
    %111 = vector.load %arg4[%c0_83, %c1_84, %c0_85, %c0_86] : memref<1x2x4x1xf32, #tpu.memory_space<vmem>>, vector<1x1x4x1xf32>
    %112 = vector.shape_cast %111 : vector<1x1x4x1xf32> to vector<4x1xf32>
    %cst_87 = arith.constant 0.000000e+00 : f32
    %113 = vector.broadcast %cst_87 : f32 to vector<4x384xf32>
    %c0_88 = arith.constant 0 : index
    %c0_89 = arith.constant 0 : index
    %114 = vector.load %arg8[%c0_88, %c0_89] : memref<4x384xf32, #tpu.memory_space<vmem>>, vector<4x384xf32>
    tpu.vector_store %arg8[%c0_88, %c0_89], %113 {strides = array<i32>} : memref<4x384xf32, #tpu.memory_space<vmem>>, vector<4x384xf32>,
    %c0_90 = arith.constant 0 : index
    %c109_91 = arith.constant 109 : index
    %115 = vector.load %arg7[%c0_90, %c109_91] : memref<4x640xf32, #tpu.memory_space<vmem>>, vector<4x384xf32>
    %c0_92 = arith.constant 0 : index
    %c0_93 = arith.constant 0 : index
    %116 = vector.load %arg8[%c0_92, %c0_93] : memref<4x384xf32, #tpu.memory_space<vmem>>, vector<4x384xf32>
    %117 = vector.extract_strided_slice %110 {offsets = [0, 0], sizes = [4, 4], strides = [1, 1]} : vector<4x36xf32> to vector<4x4xf32>
    %cst_94 = arith.constant dense<0.000000e+00> : vector<4x384xf32>
    %118 = tpu.matmul %117, %115, %cst_94 {dimension_numbers = #tpu.dot_dimension_numbers<[1], [0], [0], [1], [0, 0, 1, 1], [], []>} : vector<4x4xf32>, vector<4x384xf32>, vector<4x384xf32> -> vector<4x384xf32>
    %119 = arith.addf %116, %118 : vector<4x384xf32>
    %c0_95 = arith.constant 0 : index
    %c0_96 = arith.constant 0 : index
    %120 = vector.load %arg8[%c0_95, %c0_96] : memref<4x384xf32, #tpu.memory_space<vmem>>, vector<4x384xf32>
    tpu.vector_store %arg8[%c0_95, %c0_96], %119 {strides = array<i32>} : memref<4x384xf32, #tpu.memory_space<vmem>>, vector<4x384xf32>,
    %c0_97 = arith.constant 0 : index
    %c110_98 = arith.constant 110 : index
    %121 = vector.load %arg7[%c0_97, %c110_98] : memref<4x640xf32, #tpu.memory_space<vmem>>, vector<4x384xf32>
    %c0_99 = arith.constant 0 : index
    %c0_100 = arith.constant 0 : index
    %122 = vector.load %arg8[%c0_99, %c0_100] : memref<4x384xf32, #tpu.memory_space<vmem>>, vector<4x384xf32>
    %123 = vector.extract_strided_slice %110 {offsets = [0, 4], sizes = [4, 4], strides = [1, 1]} : vector<4x36xf32> to vector<4x4xf32>
    %cst_101 = arith.constant dense<0.000000e+00> : vector<4x384xf32>
    %124 = tpu.matmul %123, %121, %cst_101 {dimension_numbers = #tpu.dot_dimension_numbers<[1], [0], [0], [1], [0, 0, 1, 1], [], []>} : vector<4x4xf32>, vector<4x384xf32>, vector<4x384xf32> -> vector<4x384xf32>
    %125 = arith.addf %122, %124 : vector<4x384xf32>
    %c0_102 = arith.constant 0 : index
    %c0_103 = arith.constant 0 : index
    %126 = vector.load %arg8[%c0_102, %c0_103] : memref<4x384xf32, #tpu.memory_space<vmem>>, vector<4x384xf32>
    tpu.vector_store %arg8[%c0_102, %c0_103], %125 {strides = array<i32>} : memref<4x384xf32, #tpu.memory_space<vmem>>, vector<4x384xf32>,
    %c0_104 = arith.constant 0 : index
    %c111_105 = arith.constant 111 : index
    %127 = vector.load %arg7[%c0_104, %c111_105] : memref<4x640xf32, #tpu.memory_space<vmem>>, vector<4x384xf32>
    %c0_106 = arith.constant 0 : index
    %c0_107 = arith.constant 0 : index
    %128 = vector.load %arg8[%c0_106, %c0_107] : memref<4x384xf32, #tpu.memory_space<vmem>>, vector<4x384xf32>
    %129 = vector.extract_strided_slice %110 {offsets = [0, 8], sizes = [4, 4], strides = [1, 1]} : vector<4x36xf32> to vector<4x4xf32>
    %cst_108 = arith.constant dense<0.000000e+00> : vector<4x384xf32>
    %130 = tpu.matmul %129, %127, %cst_108 {dimension_numbers = #tpu.dot_dimension_numbers<[1], [0], [0], [1], [0, 0, 1, 1], [], []>} : vector<4x4xf32>, vector<4x384xf32>, vector<4x384xf32> -> vector<4x384xf32>
    %131 = arith.addf %128, %130 : vector<4x384xf32>
    %c0_109 = arith.constant 0 : index
    %c0_110 = arith.constant 0 : index
    %132 = vector.load %arg8[%c0_109, %c0_110] : memref<4x384xf32, #tpu.memory_space<vmem>>, vector<4x384xf32>
    tpu.vector_store %arg8[%c0_109, %c0_110], %131 {strides = array<i32>} : memref<4x384xf32, #tpu.memory_space<vmem>>, vector<4x384xf32>,
    %c0_111 = arith.constant 0 : index
    %c127_112 = arith.constant 127 : index
    %133 = vector.load %arg7[%c0_111, %c127_112] : memref<4x640xf32, #tpu.memory_space<vmem>>, vector<4x384xf32>
    %c0_113 = arith.constant 0 : index
    %c0_114 = arith.constant 0 : index
    %134 = vector.load %arg8[%c0_113, %c0_114] : memref<4x384xf32, #tpu.memory_space<vmem>>, vector<4x384xf32>
    %135 = vector.extract_strided_slice %110 {offsets = [0, 12], sizes = [4, 4], strides = [1, 1]} : vector<4x36xf32> to vector<4x4xf32>
    %cst_115 = arith.constant dense<0.000000e+00> : vector<4x384xf32>
    %136 = tpu.matmul %135, %133, %cst_115 {dimension_numbers = #tpu.dot_dimension_numbers<[1], [0], [0], [1], [0, 0, 1, 1], [], []>} : vector<4x4xf32>, vector<4x384xf32>, vector<4x384xf32> -> vector<4x384xf32>
    %137 = arith.addf %134, %136 : vector<4x384xf32>
    %c0_116 = arith.constant 0 : index
    %c0_117 = arith.constant 0 : index
    %138 = vector.load %arg8[%c0_116, %c0_117] : memref<4x384xf32, #tpu.memory_space<vmem>>, vector<4x384xf32>
    tpu.vector_store %arg8[%c0_116, %c0_117], %137 {strides = array<i32>} : memref<4x384xf32, #tpu.memory_space<vmem>>, vector<4x384xf32>,
    %c0_118 = arith.constant 0 : index
    %c128_119 = arith.constant 128 : index
    %139 = vector.load %arg7[%c0_118, %c128_119] : memref<4x640xf32, #tpu.memory_space<vmem>>, vector<4x384xf32>
    %c0_120 = arith.constant 0 : index
    %c0_121 = arith.constant 0 : index
    %140 = vector.load %arg8[%c0_120, %c0_121] : memref<4x384xf32, #tpu.memory_space<vmem>>, vector<4x384xf32>
    %141 = vector.extract_strided_slice %110 {offsets = [0, 16], sizes = [4, 4], strides = [1, 1]} : vector<4x36xf32> to vector<4x4xf32>
    %cst_122 = arith.constant dense<0.000000e+00> : vector<4x384xf32>
    %142 = tpu.matmul %141, %139, %cst_122 {dimension_numbers = #tpu.dot_dimension_numbers<[1], [0], [0], [1], [0, 0, 1, 1], [], []>} : vector<4x4xf32>, vector<4x384xf32>, vector<4x384xf32> -> vector<4x384xf32>
    %143 = arith.addf %140, %142 : vector<4x384xf32>
    %c0_123 = arith.constant 0 : index
    %c0_124 = arith.constant 0 : index
    %144 = vector.load %arg8[%c0_123, %c0_124] : memref<4x384xf32, #tpu.memory_space<vmem>>, vector<4x384xf32>
    tpu.vector_store %arg8[%c0_123, %c0_124], %143 {strides = array<i32>} : memref<4x384xf32, #tpu.memory_space<vmem>>, vector<4x384xf32>,
    %c0_125 = arith.constant 0 : index
    %c129_126 = arith.constant 129 : index
    %145 = vector.load %arg7[%c0_125, %c129_126] : memref<4x640xf32, #tpu.memory_space<vmem>>, vector<4x384xf32>
    %c0_127 = arith.constant 0 : index
    %c0_128 = arith.constant 0 : index
    %146 = vector.load %arg8[%c0_127, %c0_128] : memref<4x384xf32, #tpu.memory_space<vmem>>, vector<4x384xf32>
    %147 = vector.extract_strided_slice %110 {offsets = [0, 20], sizes = [4, 4], strides = [1, 1]} : vector<4x36xf32> to vector<4x4xf32>
    %cst_129 = arith.constant dense<0.000000e+00> : vector<4x384xf32>
    %148 = tpu.matmul %147, %145, %cst_129 {dimension_numbers = #tpu.dot_dimension_numbers<[1], [0], [0], [1], [0, 0, 1, 1], [], []>} : vector<4x4xf32>, vector<4x384xf32>, vector<4x384xf32> -> vector<4x384xf32>
    %149 = arith.addf %146, %148 : vector<4x384xf32>
    %c0_130 = arith.constant 0 : index
    %c0_131 = arith.constant 0 : index
    %150 = vector.load %arg8[%c0_130, %c0_131] : memref<4x384xf32, #tpu.memory_space<vmem>>, vector<4x384xf32>
    tpu.vector_store %arg8[%c0_130, %c0_131], %149 {strides = array<i32>} : memref<4x384xf32, #tpu.memory_space<vmem>>, vector<4x384xf32>,
    %c0_132 = arith.constant 0 : index
    %c145_133 = arith.constant 145 : index
    %151 = vector.load %arg7[%c0_132, %c145_133] : memref<4x640xf32, #tpu.memory_space<vmem>>, vector<4x384xf32>
    %c0_134 = arith.constant 0 : index
    %c0_135 = arith.constant 0 : index
    %152 = vector.load %arg8[%c0_134, %c0_135] : memref<4x384xf32, #tpu.memory_space<vmem>>, vector<4x384xf32>
    %153 = vector.extract_strided_slice %110 {offsets = [0, 24], sizes = [4, 4], strides = [1, 1]} : vector<4x36xf32> to vector<4x4xf32>
    %cst_136 = arith.constant dense<0.000000e+00> : vector<4x384xf32>
    %154 = tpu.matmul %153, %151, %cst_136 {dimension_numbers = #tpu.dot_dimension_numbers<[1], [0], [0], [1], [0, 0, 1, 1], [], []>} : vector<4x4xf32>, vector<4x384xf32>, vector<4x384xf32> -> vector<4x384xf32>
    %155 = arith.addf %152, %154 : vector<4x384xf32>
    %c0_137 = arith.constant 0 : index
    %c0_138 = arith.constant 0 : index
    %156 = vector.load %arg8[%c0_137, %c0_138] : memref<4x384xf32, #tpu.memory_space<vmem>>, vector<4x384xf32>
    tpu.vector_store %arg8[%c0_137, %c0_138], %155 {strides = array<i32>} : memref<4x384xf32, #tpu.memory_space<vmem>>, vector<4x384xf32>,
    %c0_139 = arith.constant 0 : index
    %c146_140 = arith.constant 146 : index
    %157 = vector.load %arg7[%c0_139, %c146_140] : memref<4x640xf32, #tpu.memory_space<vmem>>, vector<4x384xf32>
    %c0_141 = arith.constant 0 : index
    %c0_142 = arith.constant 0 : index
    %158 = vector.load %arg8[%c0_141, %c0_142] : memref<4x384xf32, #tpu.memory_space<vmem>>, vector<4x384xf32>
    %159 = vector.extract_strided_slice %110 {offsets = [0, 28], sizes = [4, 4], strides = [1, 1]} : vector<4x36xf32> to vector<4x4xf32>
    %cst_143 = arith.constant dense<0.000000e+00> : vector<4x384xf32>
    %160 = tpu.matmul %159, %157, %cst_143 {dimension_numbers = #tpu.dot_dimension_numbers<[1], [0], [0], [1], [0, 0, 1, 1], [], []>} : vector<4x4xf32>, vector<4x384xf32>, vector<4x384xf32> -> vector<4x384xf32>
    %161 = arith.addf %158, %160 : vector<4x384xf32>
    %c0_144 = arith.constant 0 : index
    %c0_145 = arith.constant 0 : index
    %162 = vector.load %arg8[%c0_144, %c0_145] : memref<4x384xf32, #tpu.memory_space<vmem>>, vector<4x384xf32>
    tpu.vector_store %arg8[%c0_144, %c0_145], %161 {strides = array<i32>} : memref<4x384xf32, #tpu.memory_space<vmem>>, vector<4x384xf32>,
    %c0_146 = arith.constant 0 : index
    %c147_147 = arith.constant 147 : index
    %163 = vector.load %arg7[%c0_146, %c147_147] : memref<4x640xf32, #tpu.memory_space<vmem>>, vector<4x384xf32>
    %c0_148 = arith.constant 0 : index
    %c0_149 = arith.constant 0 : index
    %164 = vector.load %arg8[%c0_148, %c0_149] : memref<4x384xf32, #tpu.memory_space<vmem>>, vector<4x384xf32>
    %165 = vector.extract_strided_slice %110 {offsets = [0, 32], sizes = [4, 4], strides = [1, 1]} : vector<4x36xf32> to vector<4x4xf32>
    %cst_150 = arith.constant dense<0.000000e+00> : vector<4x384xf32>
    %166 = tpu.matmul %165, %163, %cst_150 {dimension_numbers = #tpu.dot_dimension_numbers<[1], [0], [0], [1], [0, 0, 1, 1], [], []>} : vector<4x4xf32>, vector<4x384xf32>, vector<4x384xf32> -> vector<4x384xf32>
    %167 = arith.addf %164, %166 : vector<4x384xf32>
    %c0_151 = arith.constant 0 : index
    %c0_152 = arith.constant 0 : index
    %168 = vector.load %arg8[%c0_151, %c0_152] : memref<4x384xf32, #tpu.memory_space<vmem>>, vector<4x384xf32>
    tpu.vector_store %arg8[%c0_151, %c0_152], %167 {strides = array<i32>} : memref<4x384xf32, #tpu.memory_space<vmem>>, vector<4x384xf32>,
    %c0_153 = arith.constant 0 : index
    %c0_154 = arith.constant 0 : index
    %169 = vector.load %arg8[%c0_153, %c0_154] : memref<4x384xf32, #tpu.memory_space<vmem>>, vector<4x384xf32>
    %170 = vector.broadcast %112 : vector<4x1xf32> to vector<4x384xf32>
    %171 = arith.addf %169, %170 : vector<4x384xf32>
    %172 = vector.broadcast %17 : vector<1x384xf32> to vector<4x384xf32>
    %173 = arith.mulf %171, %172 : vector<4x384xf32>
    %cst_155 = arith.constant dense<0.000000e+00> : vector<4xf32>
    %174 = vector.multi_reduction <add>, %173, %cst_155 [1] : vector<4x384xf32> to vector<4xf32>
    %175 = vector.shape_cast %174 : vector<4xf32> to vector<4x1xf32>
    %cst_156 = arith.constant 3.906250e-03 : f32
    %176 = vector.broadcast %cst_156 : f32 to vector<4x1xf32>
    %177 = arith.mulf %175, %176 : vector<4x1xf32>
    %178 = vector.broadcast %177 : vector<4x1xf32> to vector<4x384xf32>
    %179 = arith.subf %171, %178 : vector<4x384xf32>
    %180 = arith.mulf %179, %179 : vector<4x384xf32>
    %181 = vector.broadcast %17 : vector<1x384xf32> to vector<4x384xf32>
    %182 = arith.mulf %180, %181 : vector<4x384xf32>
    %cst_157 = arith.constant dense<0.000000e+00> : vector<4xf32>
    %183 = vector.multi_reduction <add>, %182, %cst_157 [1] : vector<4x384xf32> to vector<4xf32>
    %184 = vector.shape_cast %183 : vector<4xf32> to vector<4x1xf32>
    %cst_158 = arith.constant 3.906250e-03 : f32
    %185 = vector.broadcast %cst_158 : f32 to vector<4x1xf32>
    %186 = arith.mulf %184, %185 : vector<4x1xf32>
    %cst_159 = arith.constant 9.99999974E-6 : f32
    %187 = vector.broadcast %cst_159 : f32 to vector<4x1xf32>
    %188 = arith.addf %186, %187 : vector<4x1xf32>
    %189 = math.rsqrt %188 : vector<4x1xf32>
    %190 = vector.broadcast %189 : vector<4x1xf32> to vector<4x384xf32>
    %191 = arith.mulf %179, %190 : vector<4x384xf32>
    %192 = arith.addf %191, %21 : vector<4x384xf32>
    %193 = vector.broadcast %17 : vector<1x384xf32> to vector<4x384xf32>
    %194 = arith.mulf %192, %193 : vector<4x384xf32>
    %c0_160 = arith.constant 0 : index
    %c128_161 = arith.constant 128 : index
    %195 = vector.load %arg6[%c0_160, %c128_161] : memref<4x640xf32, #tpu.memory_space<vmem>>, vector<4x384xf32>
    tpu.vector_store %arg6[%c0_160, %c128_161], %194 {strides = array<i32>} : memref<4x640xf32, #tpu.memory_space<vmem>>, vector<4x384xf32>,
    %c1_i32 = arith.constant 1 : i32
    %196 = arith.cmpi eq, %arg1, %c1_i32 : i32
    %197 = arith.extui %196 : i1 to i32
    %c0_i32_162 = arith.constant 0 : i32
    %198 = arith.cmpi ne, %197, %c0_i32_162 : i32
    scf.if %198 {
      %c0_163 = arith.constant 0 : index
      %c0_164 = arith.constant 0 : index
      %c0_165 = arith.constant 0 : index
      %199 = vector.load %arg5[%c0_163, %c0_164, %c0_165] : memref<1x4x384xf32, #tpu.memory_space<vmem>>, vector<1x4x384xf32>
      %200 = vector.shape_cast %199 : vector<1x4x384xf32> to vector<4x384xf32>
      %201 = vector.shape_cast %192 : vector<4x384xf32> to vector<1x4x384xf32>
      tpu.vector_store %arg5[%c0_163, %c0_164, %c0_165], %201 {strides = array<i32>} : memref<1x4x384xf32, #tpu.memory_space<vmem>>, vector<1x4x384xf32>,
    } else {
    }
    return
  }
  func.func @transform_0(%arg0: i32, %arg1: i32) -> (i32, i32, i32) {
    %c0_i32 = arith.constant 0 : i32
    %c0_i32_0 = arith.constant 0 : i32
    %c0_i32_1 = arith.constant 0 : i32
    return %arg0, %c0_i32, %c0_i32_0 : i32, i32, i32
  }
  func.func @transform_1(%arg0: i32, %arg1: i32) -> (i32, i32, i32, i32) {
    %c0_i32 = arith.constant 0 : i32
    %c0_i32_0 = arith.constant 0 : i32
    %c0_i32_1 = arith.constant 0 : i32
    %c0_i32_2 = arith.constant 0 : i32
    return %arg1, %c0_i32, %c0_i32_0, %c0_i32_1 : i32, i32, i32, i32
  }
  func.func @transform_2(%arg0: i32, %arg1: i32) -> (i32, i32, i32, i32) {
    %c0_i32 = arith.constant 0 : i32
    %c0_i32_0 = arith.constant 0 : i32
    %c0_i32_1 = arith.constant 0 : i32
    %c0_i32_2 = arith.constant 0 : i32
    return %arg1, %c0_i32, %c0_i32_0, %c0_i32_1 : i32, i32, i32, i32
  }
  func.func @transform_3(%arg0: i32, %arg1: i32) -> (i32, i32, i32) {
    %c0_i32 = arith.constant 0 : i32
    %c0_i32_0 = arith.constant 0 : i32
    %c0_i32_1 = arith.constant 0 : i32
    return %arg0, %c0_i32, %c0_i32_0 : i32, i32, i32
  }
}

</mosaic_0001>

<bundles_post_ra>
// kernel: resblocks_forward.1
= control target key start
LH: loop header
LB: loop body
LE: loop exit
PB: predicated region body
PF: predicated region fallthrough
CT: control target
= control target key end

     0   :  { %s2686_s12 = smov 0   ;;  %s2688_s13 = smov 0   ;;  %s3137_s0 = inlined_call_operand.vmem [shape: f32[2,4,640], index: 0, kind: input, shape index: {}]   ;;  %s3138_s1 = inlined_call_operand.vmem [shape: f32[2,2,4,36], index: 1, kind: input, shape index: {}]   ;;  %s3139_s2 = inlined_call_operand.vmem [shape: f32[2,2,4,1], index: 2, kind: input, shape index: {}]   ;;  %s3140_s3 = inlined_call_operand.vmem [shape: f32[2,4,384], index: 3, kind: output, shape index: {}]  }
   0x1   :  { %s2690_s14 = smov 0   ;;  %s2692_s15 = smov 0  }
   0x2   :  { %s2694_s16 = smov 0  }
   0x3 LB: > { %s22_s17 = sadd.s32 1, %s2635_s14  ;;  %s25_s18 = sadd.s32 1, %s2639_s15  ;;  %s2643_s16 = sphi %s2694_s16, %s13_s16   ;;  %s2639_s15 = sphi %s2692_s15, %s3144_s15   ;;  %s2635_s14 = sphi %s2690_s14, %s3143_s14   ;;  %s2631_s13 = sphi %s2688_s13, %s3142_s13   ;;  %s2627_s12 = sphi %s2686_s12, %s3141_s12  }
   0x4   : > { %p23_p0 = scmp.ge.s32.totalorder %s22_s17, 2  ;;  %p2410_p1 = scmp.ge.s32.totalorder %s2643_s16, 1 }
   0x5   : > { %p169_p2 = scmp.lt.s32.totalorder %s2643_s16, 5 }
   0x6   : > { %s3146_s17 = smov (%p23_p0, %s22_s17), 0  ;;  %s3148_s18 = smov (!%p23_p0, %s25_s18), %s2639_s15 }
   0x7   : > { %p170_p3 = pnand %p2410_p1, %p169_p2  ;;  %p27_p4 = scmp.ge.s32.totalorder %s3148_s18, 2 }
   0x8   : > { %p203_p5 = scmp.lt.s32.totalorder (!%p170_p3), %s2631_s13, 1  ;;  %p208_p6 = scmp.lt.s32.totalorder (!%p170_p3), %s2627_s12, 1 }
   0x9   : > { %s3150_s18 = smov (%p27_p4, %s3148_s18), 0  ;;  %173 = sbr.rel (%p170_p3) target bundleno = 1418 (0x58a), region = 32 }
   0xa   : > { %p2417_p7 = scmp.ne.s32.totalorder (!%p170_p3), %s2627_s12, 0 }
   0xe   : > { %v223_v0 = vlaneseq  ;;  %v2645_v1 = vmov 18.0   ;;  %s3152_s13 = smov (!%p203_p5, %s2631_s13), 1  ;;  %v2646_v29 = vmov 0.0  }
   0xf   : > { %2596 = vrcp.f32 %v2645_v1  ;;  %s209_s19 = scalar_select %p208_p6, %s2627_s12, 1 }
  0x10   : > { %v224_v2 = vand.u32 127, %v223_v0  ;;  %s2533_s20 = smul.u32 20, %s3152_s13 }
  0x11   : > { %s2531_s21 = sshll.u32 %s209_s19, 3  ;;  %s2534_s22 = smul.u32 12, %s3152_s13 }
  0x12   : > { %v225_v3 = vadd.s32 128, %v224_v2  ;;  %v226_v4 = vadd.s32 256, %v224_v2  ;;  %s2723_s25 = scalar_lea.vmem %s3137_s0, %s2533_s20  ;;  %s2728_s28 = scalar_lea.vmem %s3138_s1, %s2531_s21  ;;  %v227_v7 = vcvt.s32.f32 %v224_v2 }
  0x13   : > { %s2733_s4 = scalar_lea.vmem %s3139_s2, %s2531_s21  ;;  %s2738_s7 = scalar_lea.vmem %s3140_s3, %s2534_s22 }
  0x14   : > { %v228_v8 = vcvt.s32.f32 %v225_v3  ;;  %v229_v9 = vcvt.s32.f32 %v226_v4  ;;  %v230_v12 = vadd.f32 0.5, %v227_v7  ;;  %vm257_vm1 = vcmp.lt.s32.totalorder %v226_v4, 288 }
  0x15   : > { %v2597_v5 = vpop.eup %2596 }
  0x16   : > { %v234_v6 = vmul.f32 18.0, %v2597_v5  ;;  %v231_v13 = vadd.f32 0.5, %v228_v8  ;;  %v232_v14 = vadd.f32 0.5, %v229_v9  ;;  %vm238_vm0 = vweird.f32 %v2597_v5 }
  0x18   : > { %v235_v10 = vsub.f32 1.0, %v234_v6 }
  0x1a   : > { %v236_v11 = vmul.f32 %v2597_v5, %v235_v10 }
  0x1c   : > { %v237_v15 = vadd.f32 %v2597_v5, %v236_v11 }
  0x1e   : > { %v239_v16 = vsel %vm238_vm0, %v2597_v5, %v237_v15 }
  0x1f   : > { %v240_v17 = vmul.f32 %v239_v16, %v230_v12  ;;  %v241_v18 = vmul.f32 %v239_v16, %v231_v13  ;;  %v242_v19 = vmul.f32 %v239_v16, %v232_v14 }
  0x21   : > { %v243_v20 = vfloor.f32 %v240_v17  ;;  %v244_v21 = vfloor.f32 %v241_v18  ;;  %v245_v22 = vfloor.f32 %v242_v19 }
  0x23   : > { %v246_v23 = vmul.f32 18.0, %v243_v20  ;;  %v247_v24 = vmul.f32 18.0, %v244_v21  ;;  %v248_v25 = vmul.f32 18.0, %v245_v22 }
  0x25   : > { %v249_v26 = vsub.f32 %v227_v7, %v246_v23  ;;  %v250_v27 = vsub.f32 %v228_v8, %v247_v24  ;;  %v251_v28 = vsub.f32 %v229_v9, %v248_v25  ;;  %267 = sbr.rel (%p2417_p7) target bundleno = 49 (0x31), region = 36 }
  0x27   : > { %vm252_vm2 = vcmp.lt.f32.partialorder %v249_v26, 16.0  ;;  %vm253_vm3 = vcmp.lt.f32.partialorder %v250_v27, 16.0  ;;  %vm254_vm4 = vcmp.lt.f32.partialorder %v251_v28, 16.0 }
  0x28   : > { %vm260_vm5 = vmand %vm254_vm4, %vm257_vm1  ;;  %v2741_v30 = vsel %vm252_vm2, 1.0, %v2646_v29  ;;  %v2744_v31 = vsel %vm253_vm3, 1.0, %v2646_v29 }
  0x29   : > { %v2747_v32 = vsel %vm260_vm5, 1.0, %v2646_v29 }
  0x2a   : > { %v268_v33 = vld [vmem:[%s2723_s25] sm:$0xff]  ;;  %v269_v34 = vld [vmem:[%s2723_s25 + $0x8] sm:$0xff]  ;;  %v270_v35 = vld [vmem:[%s2723_s25 + $0x10] sm:$0xf]  ;;  %v2647_v36 = vmov 0.0  }
  0x2b   : > { %271 = vst [vmem:[#allocation2] sm:$0xff] %v268_v33 }
  0x2c   : > { %272 = vst [vmem:[#allocation2 + $0x8] sm:$0xff] %v269_v34 }
  0x2d   : > { %273 = vst [vmem:[#allocation2 + $0x10] sm:$0xf] %v270_v35 }
  0x2e   : > { %274 = vst [vmem:[#allocation3] sm:$0xff] %v2647_v36 }
  0x2f   : > { %275 = vst [vmem:[#allocation3 + $0x8] sm:$0xff] %v2647_v36 }
  0x30   : > { %276 = vst [vmem:[#allocation3 + $0x10] sm:$0xf] %v2647_v36 }
  0x31 PF: > { %282 = vst [vmem:[#allocation4 + $0x8] sm:$0xf] %v2646_v29  ;;  %s2648_s8 = smov 19   ;;  %s2649_s9 = smov 18   ;;  %v2760_v47 = vld [vmem:[%s2728_s28] sm:$0xf] }
  0x32   : > { %v283_v38 = vld [vmem:[#allocation2] sm:$0xff]  ;;  %s2650_s10 = smov 124   ;;  %s2651_s11 = smov 17   ;;  %vm411_vm6 = vcmask 146432   ;;  %vm312_vm7 = vcmask 1043456   ;;  %vm304_vm8 = vcmask 154624  }
  0x33   : > { %v284_v37 = vld [vmem:[#allocation2 + $0x8] sm:$0xff]  ;;  %289 = vst [vmem:[#allocation1] ss:$2 sm:$0xff] %v283_v38  ;;  %s2652_s13 = smov 120   ;;  %s2653_s19 = smov 1   ;;  %vm308_vm9 = vcmask 31744  }
  0x34   : > { %291 = vst [vmem:[#allocation1 + $0x10] ss:$2 sm:$0xff] %v284_v37  ;;  %v2766_v52 = vld [vmem:[#allocation2 + $0xc] sm:$0xf]  ;;  %v2768_v53 = vld [vmem:[#allocation2 + $0x4] sm:$0xff]  ;;  %s2654_s20 = smov 116  }
  0x35   : > { %v790_v58 = vld [vmem:[#allocation2 + $0xc] sm:$0xff]  ;;  %s2655_s21 = smov 112   ;;  %s2656_s22 = smov 127   ;;  %vm515_vm10 = vcmask 138240   ;;  %vm619_vm11 = vcmask 7168   ;;  %vm812_vm12 = vcmask 1039360  }
  0x36   : > { %s2657_s23 = smov 108   ;;  %s2658_s24 = smov 111   ;;  %vm916_vm13 = vcmask 908288   ;;  %vm1020_vm14 = vcmask 900096   ;;  %vm1124_vm15 = vcmask 891904  }
  0x37   : > { %s2659_s25 = smov 104   ;;  %s2660_s26 = smov 110  }
  0x38   : > { %s2661_s27 = smov 100   ;;  %s2662_s29 = smov 109  }
  0x39   : > { %s2663_s30 = smov 96   ;;  %p2528_p8 = scmp.ne.s32.totalorder %s2627_s12, 1 }
  0x3a   : > { %v293_v41 = vld.sshfl [vmem:[#allocation1 + $0x8] sm:$0xff pattern:$0x75316420]  ;;  %v292_v42 = vld.sshfl [vmem:[#allocation1] sm:$0xff pattern:$0x75316420] }
  0x3b   : > { %v294_v39 = vld.sshfl [vmem:[#allocation1 + $0x10] sm:$0xff pattern:$0x75316420]  ;;  %v295_v40 = vld.sshfl [vmem:[#allocation1 + $0x18] sm:$0xff pattern:$0x75316420]  ;;  %298 = vrot.lane.b32.xlu1 %v293_v41, %s2648_s8 }
  0x3c   : > { %300 = vrot.lane.b32.xlu0 %v294_v39, %s2648_s8  ;;  %398 = vst [vmem:[#allocation1 + $0x10] ss:$2 sm:$0xff] %v284_v37 }
  0x3d   : > { %396 = vst [vmem:[#allocation1] ss:$2 sm:$0xff] %v283_v38 }
  0x43   : > { %v401_v43 = vld.sshfl [vmem:[#allocation1 + $0x10] sm:$0xff pattern:$0x75316420]  ;;  %v402_v44 = vld.sshfl [vmem:[#allocation1 + $0x18] sm:$0xff pattern:$0x75316420]  ;;  %296 = vrot.lane.b32.xlu1 %v292_v42, %s2648_s8 }
  0x44   : > { %302 = vrot.lane.b32.xlu0 %v295_v40, %s2648_s8  ;;  %v399_v45 = vld.sshfl [vmem:[#allocation1] sm:$0xff pattern:$0x75316420]  ;;  %502 = vst [vmem:[#allocation1 + $0x10] ss:$2 sm:$0xff] %v284_v37 }
  0x45   : > { %403 = vrot.lane.b32.xlu2 %v399_v45, %s2649_s9  ;;  %v400_v46 = vld.sshfl [vmem:[#allocation1 + $0x8] sm:$0xff pattern:$0x75316420] }
  0x46   : > { %500 = vst [vmem:[#allocation1] ss:$2 sm:$0xff] %v283_v38 }
  0x4b   : > { %v505_v48 = vld.sshfl [vmem:[#allocation1 + $0x10] sm:$0xff pattern:$0x75316420]  ;;  %v506_v49 = vld.sshfl [vmem:[#allocation1 + $0x18] sm:$0xff pattern:$0x75316420]  ;;  %407 = vrot.lane.b32.xlu1 %v401_v43, %s2649_s9 }
  0x4c   : > { %392 = vrot.lane.b32.xlu0 %v2760_v47, %s2650_s10  ;;  %606 = vst [vmem:[#allocation1 + $0x10] ss:$2 sm:$0xff] %v284_v37 }
  0x4d   : > { %405 = vrot.lane.b32.xlu2 %v400_v46, %s2649_s9  ;;  %v503_v50 = vld.sshfl [vmem:[#allocation1] sm:$0xff pattern:$0x75316420]  ;;  %v504_v51 = vld.sshfl [vmem:[#allocation1 + $0x8] sm:$0xff pattern:$0x75316420] }
  0x4e   : > { %604 = vst [vmem:[#allocation1] ss:$2 sm:$0xff] %v283_v38 }
  0x53   : > { %v609_v54 = vld.sshfl [vmem:[#allocation1 + $0x10] sm:$0xff pattern:$0x75316420]  ;;  %v610_v55 = vld.sshfl [vmem:[#allocation1 + $0x18] sm:$0xff pattern:$0x75316420]  ;;  %409 = vrot.lane.b32.xlu1 %v402_v44, %s2649_s9 }
  0x54   : > { %511 = vrot.lane.b32.xlu0 %v505_v48, %s2651_s11  ;;  %708 = vst [vmem:[#allocation1 + $0x10] ss:$2 sm:$0xff] %v2766_v52 }
  0x55   : > { %v608_v56 = vld.sshfl [vmem:[#allocation1 + $0x8] sm:$0xff pattern:$0x75316420]  ;;  %496 = vrot.lane.b32.xlu2 %v2760_v47, %s2652_s13  ;;  %v607_v57 = vld.sshfl [vmem:[#allocation1] sm:$0xff pattern:$0x75316420] }
  0x56   : > { %706 = vst [vmem:[#allocation1] ss:$2 sm:$0xff] %v2768_v53 }
  0x5b   : > { %v2777_v59 = vld.sshfl [vmem:[#allocation1 + $0x10] sm:$0xff pattern:$0x75316420]  ;;  %613 = vrot.lane.b32.xlu1 %v608_v56, %s2653_s19 }
  0x5c   : > { %507 = vrot.lane.b32.xlu0 %v503_v50, %s2651_s11  ;;  %799 = vst [vmem:[#allocation1 + $0x10] ss:$2 sm:$0xff] %v790_v58 }
  0x5d   : > { %509 = vrot.lane.b32.xlu2 %v504_v51, %s2651_s11  ;;  %v2781_v60 = vld.sshfl [vmem:[#allocation1] sm:$0xff pattern:$0x75316420]  ;;  %v2783_v61 = vld.sshfl [vmem:[#allocation1 + $0x8] sm:$0xff pattern:$0x75316420] }
  0x5e   : > { %797 = vst [vmem:[#allocation1] ss:$2 sm:$0xff] %v2768_v53 }
  0x63   : > { %v802_v62 = vld.sshfl [vmem:[#allocation1 + $0x10] sm:$0xff pattern:$0x75316420]  ;;  %v803_v63 = vld.sshfl [vmem:[#allocation1 + $0x18] sm:$0xff pattern:$0x75316420]  ;;  %600 = vrot.lane.b32.xlu1 %v2760_v47, %s2654_s20 }
  0x64   : > { %513 = vrot.lane.b32.xlu0 %v506_v49, %s2651_s11  ;;  %903 = vst [vmem:[#allocation1 + $0x10] ss:$2 sm:$0xff] %v790_v58 }
  0x65   : > { %615 = vrot.lane.b32.xlu2 %v609_v54, %s2653_s19  ;;  %v801_v0 = vld.sshfl [vmem:[#allocation1 + $0x8] sm:$0xff pattern:$0x75316420]  ;;  %v800_v1 = vld.sshfl [vmem:[#allocation1] sm:$0xff pattern:$0x75316420] }
  0x66   : > { %901 = vst [vmem:[#allocation1] ss:$2 sm:$0xff] %v2768_v53 }
  0x6b   : > { %v906_v2 = vld.sshfl [vmem:[#allocation1 + $0x10] sm:$0xff pattern:$0x75316420]  ;;  %v907_v3 = vld.sshfl [vmem:[#allocation1 + $0x18] sm:$0xff pattern:$0x75316420]  ;;  %702 = vrot.lane.b32.xlu1 %v2760_v47, %s2655_s21 }
  0x6c   : > { %611 = vrot.lane.b32.xlu0 %v607_v57, %s2653_s19  ;;  %1007 = vst [vmem:[#allocation1 + $0x10] ss:$2 sm:$0xff] %v790_v58 }
  0x6d   : > { %617 = vrot.lane.b32.xlu2 %v610_v55, %s2653_s19  ;;  %v905_v4 = vld.sshfl [vmem:[#allocation1 + $0x8] sm:$0xff pattern:$0x75316420]  ;;  %v904_v5 = vld.sshfl [vmem:[#allocation1] sm:$0xff pattern:$0x75316420] }
  0x6e   : > { %1005 = vst [vmem:[#allocation1] ss:$2 sm:$0xff] %v2768_v53 }
  0x73   : > { %v1010_v6 = vld.sshfl [vmem:[#allocation1 + $0x10] sm:$0xff pattern:$0x75316420]  ;;  %v1011_v7 = vld.sshfl [vmem:[#allocation1 + $0x18] sm:$0xff pattern:$0x75316420]  ;;  %793 = vrot.lane.b32.xlu1 %v2760_v47, %s2657_s23 }
  0x74   : > { %806 = vrot.lane.b32.xlu0 %v801_v0, %s2656_s22  ;;  %1111 = vst [vmem:[#allocation1 + $0x10] ss:$2 sm:$0xff] %v790_v58 }
  0x75   : > { %804 = vrot.lane.b32.xlu2 %v800_v1, %s2656_s22  ;;  %v1008_v8 = vld.sshfl [vmem:[#allocation1] sm:$0xff pattern:$0x75316420]  ;;  %v1009_v9 = vld.sshfl [vmem:[#allocation1 + $0x8] sm:$0xff pattern:$0x75316420] }
  0x76   : > { %1109 = vst [vmem:[#allocation1] ss:$2 sm:$0xff] %v2768_v53 }
  0x7b   : > { %912 = vrot.lane.b32.xlu1 %v906_v2, %s2658_s24  ;;  %v1115_v10 = vld.sshfl [vmem:[#allocation1 + $0x18] sm:$0xff pattern:$0x75316420]  ;;  %v1114_v12 = vld.sshfl [vmem:[#allocation1 + $0x10] sm:$0xff pattern:$0x75316420] }
  0x7c   : > { %910 = vrot.lane.b32.xlu0 %v905_v4, %s2658_s24  ;;  %v2664_v4 = vmov 0  }
  0x7d   : > { %808 = vrot.lane.b32.xlu2 %v802_v62, %s2656_s22  ;;  %v1113_v11 = vld.sshfl [vmem:[#allocation1 + $0x8] sm:$0xff pattern:$0x75316420]  ;;  %v1112_v14 = vld.sshfl [vmem:[#allocation1] sm:$0xff pattern:$0x75316420]  ;;  %2598 = vset.pattern.permute.xlu1 %v2664_v4 }
  0x7e   : > { %2599 = vset.pattern.permute.xlu2 %v2664_v4  ;;  %2600 = vset.pattern.permute.xlu0 %v2664_v4 }
  0x83   : > { %908 = vrot.lane.b32.xlu1 %v904_v5, %s2658_s24 }
  0x84   : > { %897 = vrot.lane.b32.xlu0 %v2760_v47, %s2659_s25 }
  0x85   : > { %810 = vrot.lane.b32.xlu2 %v803_v63, %s2656_s22 }
  0x8b   : > { %914 = vrot.lane.b32.xlu1 %v907_v3, %s2658_s24  ;;  %v280_v3 = vld [vmem:[%s2733_s4] sm:$0xf] }
  0x8c   : > { %1016 = vrot.lane.b32.xlu0 %v1010_v6, %s2660_s26 }
  0x8d   : > { %1014 = vrot.lane.b32.xlu2 %v1009_v9, %s2660_s26 }
  0x93   : > { %1012 = vrot.lane.b32.xlu1 %v1008_v8, %s2660_s26 }
  0x94   : > { %1018 = vrot.lane.b32.xlu0 %v1011_v7, %s2660_s26 }
  0x95   : > { %1001 = vrot.lane.b32.xlu2 %v2760_v47, %s2661_s27 }
  0x9b   : > { %1118 = vrot.lane.b32.xlu1 %v1113_v11, %s2662_s29 }
  0x9c   : > { %1122 = vrot.lane.b32.xlu0 %v1115_v10, %s2662_s29 }
  0x9d   : > { %1120 = vrot.lane.b32.xlu2 %v1114_v12, %s2662_s29 }
  0x9f   : > { %v404_v13 = vpop.permute.xlu2 %403 }
  0xa3   : > { %1209 = vperm.xlu1 %2598, %v280_v3  }
  0xa4   : > { %1116 = vrot.lane.b32.xlu0 %v1112_v14, %s2662_s29 }
  0xa5   : > { %1105 = vrot.lane.b32.xlu2 %v2760_v47, %s2663_s30 }
  0xa7   : > { %v406_v15 = vpop.permute.xlu2 %405 }
  0xa8   : > { %v412_v16 = vsel %vm411_vm6, %v404_v13, %v406_v15 }
  0xa9   : > { %2424 = vmatpush.msk.msra.mxu3 %vm312_vm7, %v412_v16 }
  0xad   : > { %v299_v18 = vpop.permute.xlu1 %298 }
  0xae   : > { %v301_v17 = vpop.permute.xlu0 %300 }
  0xaf   : > { %v306_v19 = vsel %vm304_vm8, %v299_v18, %v301_v17  ;;  %v497_v20 = vpop.permute.xlu2 %496 }
  0xb0   : > { %2420 = vmatpush.msk.msra.mxu1 %vm312_vm7, %v306_v19 }
  0xb1   : > { %2421 = vmatmul.msk.f32.vlgmr.msra.gmra.mxu1 %vm308_vm9, %v2760_v47 }
  0xb5   : > { %v297_v22 = vpop.permute.xlu1 %296 }
  0xb6   : > { %v303_v21 = vpop.permute.xlu0 %302  ;;  %v305_v24 = vsel %vm304_vm8, %v297_v22, %v299_v18 }
  0xb7   : > { %v307_v23 = vsel %vm304_vm8, %v301_v17, %v303_v21  ;;  %v510_v25 = vpop.permute.xlu2 %509  ;;  %2418 = vmatpush.msk.msra.mxu0 %vm312_vm7, %v305_v24 }
  0xb8   : > { %2422 = vmatpush.msk.msra.mxu2 %vm312_vm7, %v307_v23  ;;  %2419 = vmatmul.msk.f32.vlgmr.msra.gmra.mxu0 %vm308_vm9, %v2760_v47 }
  0xb9   : > { %2423 = vmatmul.msk.f32.vlgmr.msra.gmra.mxu2 %vm308_vm9, %v2760_v47 }
  0xbd   : > { %v408_v27 = vpop.permute.xlu1 %407 }
  0xbe   : > { %v393_v26 = vpop.permute.xlu0 %392  ;;  %v413_v28 = vsel %vm411_vm6, %v406_v15, %v408_v27 }
  0xbf   : > { %2425 = vmatmul.msk.f32.vlgmr.msra.gmra.mxu3 %vm308_vm9, %v393_v26  ;;  %v616_v33 = vpop.permute.xlu2 %615  ;;  %2426 = vmatpush.msk.msrb.mxu0 %vm312_vm7, %v413_v28 }
  0xc0   : > { %2427 = vmatmul.msk.f32.vlgmr.msrb.gmra.mxu0 %vm308_vm9, %v393_v26 }
  0xc5   : > { %v410_v35 = vpop.permute.xlu1 %409 }
  0xc6   : > { %v512_v34 = vpop.permute.xlu0 %511  ;;  %v414_v37 = vsel %vm411_vm6, %v408_v27, %v410_v35 }
  0xc7   : > { %v517_v36 = vsel %vm515_vm10, %v510_v25, %v512_v34  ;;  %v618_v38 = vpop.permute.xlu2 %617  ;;  %2428 = vmatpush.msk.msrb.mxu1 %vm312_vm7, %v414_v37 }
  0xc8   : > { %2432 = vmatpush.msk.msrb.mxu3 %vm312_vm7, %v517_v36  ;;  %v622_v39 = vsel %vm619_vm11, %v616_v33, %v618_v38  ;;  %2429 = vmatmul.msk.f32.vlgmr.msrb.gmra.mxu1 %vm308_vm9, %v393_v26  ;;  %v286_v26 = vld [vmem:[#allocation4 + $0x8] sm:$0xf] }
  0xc9   : > { %2433 = vmatmul.msk.f32.vlgmr.msrb.gmra.mxu3 %vm308_vm9, %v497_v20 }
  0xca   : > { %2440 = vmatpush.msk.msra.mxu3 %vm312_vm7, %v622_v39 }
  0xcd   : > { %v614_v41 = vpop.permute.xlu1 %613 }
  0xce   : > { %v508_v40 = vpop.permute.xlu0 %507  ;;  %v621_v43 = vsel %vm619_vm11, %v614_v41, %v616_v33 }
  0xcf   : > { %v516_v42 = vsel %vm515_vm10, %v508_v40, %v510_v25  ;;  %v805_v44 = vpop.permute.xlu2 %804 }
  0xd0   : > { %2430 = vmatpush.msk.msrb.mxu2 %vm312_vm7, %v516_v42 }
  0xd1   : > { %2431 = vmatmul.msk.f32.vlgmr.msrb.gmra.mxu2 %vm308_vm9, %v497_v20 }
  0xd2   : > { %2438 = vmatpush.msk.msra.mxu2 %vm312_vm7, %v621_v43 }
  0xd4   : > { %2446 = vmatpush.msk.msrb.mxu2 %vm312_vm7, %v2777_v59 }
  0xd5   : > { %v601_v46 = vpop.permute.xlu1 %600 }
  0xd6   : > { %v514_v45 = vpop.permute.xlu0 %513  ;;  %2441 = vmatmul.msk.f32.vlgmr.msra.gmra.mxu3 %vm308_vm9, %v601_v46 }
  0xd7   : > { %v518_v47 = vsel %vm515_vm10, %v512_v34, %v514_v45  ;;  %v809_v48 = vpop.permute.xlu2 %808 }
  0xd8   : > { %2434 = vmatpush.msk.msra.mxu0 %vm312_vm7, %v518_v47 }
  0xd9   : > { %2435 = vmatmul.msk.f32.vlgmr.msra.gmra.mxu0 %vm308_vm9, %v497_v20  ;;  %2439 = vmatmul.msk.f32.vlgmr.msra.gmra.mxu2 %vm308_vm9, %v601_v46 }
  0xda   : > { %2442 = vmatpush.msk.msrb.mxu0 %vm312_vm7, %v2781_v60 }
  0xdd   : > { %v703_v50 = vpop.permute.xlu1 %702 }
  0xde   : > { %v612_v49 = vpop.permute.xlu0 %611 }
  0xdf   : > { %v620_v51 = vsel %vm619_vm11, %v612_v49, %v614_v41  ;;  %v811_v54 = vpop.permute.xlu2 %810 }
  0xe0   : > { %2436 = vmatpush.msk.msra.mxu1 %vm312_vm7, %v620_v51  ;;  %v815_v55 = vsel %vm812_vm12, %v809_v48, %v811_v54 }
  0xe1   : > { %2437 = vmatmul.msk.f32.vlgmr.msra.gmra.mxu1 %vm308_vm9, %v601_v46  ;;  %2447 = vmatmul.msk.f32.vlgmr.msrb.gmra.mxu2 %vm308_vm9, %v703_v50 }
  0xe2   : > { %2443 = vmatmul.msk.f32.vlgmr.msrb.gmra.mxu0 %vm308_vm9, %v703_v50  ;;  %2444 = vmatpush.msk.msrb.mxu1 %vm312_vm7, %v2783_v61 }
  0xe4   : > { %2452 = vmatpush.msk.msra.mxu1 %vm312_vm7, %v815_v55 }
  0xe5   : > { %v794_v57 = vpop.permute.xlu1 %793 }
  0xe6   : > { %v807_v56 = vpop.permute.xlu0 %806 }
  0xe7   : > { %v813_v58 = vsel %vm812_vm12, %v805_v44, %v807_v56  ;;  %v814_v59 = vsel %vm812_vm12, %v807_v56, %v809_v48  ;;  %v1015_v63 = vpop.permute.xlu2 %1014 }
  0xe8   : > { %2448 = vmatpush.msk.msrb.mxu3 %vm312_vm7, %v813_v58  ;;  %2450 = vmatpush.msk.msra.mxu0 %vm312_vm7, %v814_v59 }
  0xe9   : > { %2445 = vmatmul.msk.f32.vlgmr.msrb.gmra.mxu1 %vm308_vm9, %v703_v50  ;;  %2449 = vmatmul.msk.f32.vlgmr.msrb.gmra.mxu3 %vm308_vm9, %v794_v57 }
  0xea   : > { %2451 = vmatmul.msk.f32.vlgmr.msra.gmra.mxu0 %vm308_vm9, %v794_v57 }
  0xed   : > { %v913_v61 = vpop.permute.xlu1 %912 }
  0xee   : > { %v911_v60 = vpop.permute.xlu0 %910 }
  0xef   : > { %v918_v62 = vsel %vm916_vm13, %v911_v60, %v913_v61  ;;  %v1002_v5 = vpop.permute.xlu2 %1001 }
  0xf0   : > { %2456 = vmatpush.msk.msra.mxu3 %vm312_vm7, %v918_v62 }
  0xf1   : > { %2453 = vmatmul.msk.f32.vlgmr.msra.gmra.mxu1 %vm308_vm9, %v794_v57 }
  0xf5   : > { %v909_v1 = vpop.permute.xlu1 %908 }
  0xf6   : > { %v898_v0 = vpop.permute.xlu0 %897  ;;  %v917_v2 = vsel %vm916_vm13, %v909_v1, %v911_v60 }
  0xf7   : > { %2457 = vmatmul.msk.f32.vlgmr.msra.gmra.mxu3 %vm308_vm9, %v898_v0  ;;  %2454 = vmatpush.msk.msra.mxu2 %vm312_vm7, %v917_v2  ;;  %v1121_v10 = vpop.permute.xlu2 %1120 }
  0xf8   : > { %2455 = vmatmul.msk.f32.vlgmr.msra.gmra.mxu2 %vm308_vm9, %v898_v0 }
  0xfd   : > { %v915_v8 = vpop.permute.xlu1 %914 }
  0xfe   : > { %v1017_v6 = vpop.permute.xlu0 %1016  ;;  %v919_v9 = vsel %vm916_vm13, %v913_v61, %v915_v8 }
  0xff   : > { %v1022_v7 = vsel %vm1020_vm14, %v1015_v63, %v1017_v6  ;;  %2458 = vmatpush.msk.msrb.mxu0 %vm312_vm7, %v919_v9  ;;  %v1106_v16 = vpop.permute.xlu2 %1105 }
 0x100   : > { %2462 = vmatpush.msk.msrb.mxu2 %vm312_vm7, %v1022_v7  ;;  %2459 = vmatmul.msk.f32.vlgmr.msrb.gmra.mxu0 %vm308_vm9, %v898_v0 }
 0x101   : > { %2463 = vmatmul.msk.f32.vlgmr.msrb.gmra.mxu2 %vm308_vm9, %v1002_v5 }
 0x105   : > { %v1013_v13 = vpop.permute.xlu1 %1012 }
 0x106   : > { %v1019_v11 = vpop.permute.xlu0 %1018  ;;  %v1021_v14 = vsel %vm1020_vm14, %v1013_v13, %v1015_v63 }
 0x107   : > { %v1023_v12 = vsel %vm1020_vm14, %v1017_v6, %v1019_v11  ;;  %2460 = vmatpush.msk.msrb.mxu1 %vm312_vm7, %v1021_v14 }
 0x108   : > { %2464 = vmatpush.msk.msrb.mxu3 %vm312_vm7, %v1023_v12  ;;  %2461 = vmatmul.msk.f32.vlgmr.msrb.gmra.mxu1 %vm308_vm9, %v1002_v5 }
 0x109   : > { %2465 = vmatmul.msk.f32.vlgmr.msrb.gmra.mxu3 %vm308_vm9, %v1002_v5 }
 0x10d   : > { %v1119_v18 = vpop.permute.xlu1 %1118 }
 0x10e   : > { %v1123_v15 = vpop.permute.xlu0 %1122  ;;  %v1126_v19 = vsel %vm1124_vm15, %v1119_v18, %v1121_v10 }
 0x10f   : > { %v1127_v17 = vsel %vm1124_vm15, %v1121_v10, %v1123_v15  ;;  %2468 = vmatpush.msk.msra.mxu1 %vm312_vm7, %v1126_v19  ;;  %v2665_v19 = vmov 839922192  }
 0x110   : > { %2470 = vmatpush.msk.msra.mxu2 %vm312_vm7, %v1127_v17  ;;  %2469 = vmatmul.msk.f32.vlgmr.msra.gmra.mxu1 %vm308_vm9, %v1106_v16 }
 0x111   : > { %2471 = vmatmul.msk.f32.vlgmr.msra.gmra.mxu2 %vm308_vm9, %v1106_v16 }
 0x116   : > { %v1117_v20 = vpop.permute.xlu0 %1116 }
 0x117   : > { %v1125_v21 = vsel %vm1124_vm15, %v1117_v20, %v1119_v18  ;;  %v1212_v20 = vunpack.c.l.s4 %v2665_v19 }
 0x118   : > { %2466 = vmatpush.msk.msra.mxu0 %vm312_vm7, %v1125_v21 }
 0x119   : > { %2467 = vmatmul.msk.f32.vlgmr.msra.gmra.mxu0 %vm308_vm9, %v1106_v16 }
 0x12e   : > { %v356_v22 = vpop.f32.mrf.mxu1 }
 0x12f   : > { %v381_v23 = vrot.slane %v356_v22, 4 }
 0x135   : > { %v336_v24 = vpop.f32.mrf.mxu0 }
 0x136   : > { %v382_v25 = vsel %vm312_vm7, %v336_v24, %v381_v23 }
 0x13c   : > { %v376_v27 = vpop.f32.mrf.mxu2 }
 0x13d   : > { %v385_v28 = vadd.f32 %v376_v27, %v286_v26  ;;  %v460_v36 = vpop.f32.mrf.mxu0  ;;  %v2913_v27 = vunpack.c.0.s8 %v1212_v20 }
 0x13e   : > { %v485_v1 = vrot.slane %v460_v36, 4 }
 0x13f   : > { %387 = vst [vmem:[#allocation4 + $0x8] sm:$0xf] %v385_v28 }
 0x142   : > { %v440_v37 = vpop.f32.mrf.mxu3 }
 0x143   : > { %v486_v2 = vsel %vm312_vm7, %v440_v37, %v485_v1  ;;  %v1220_v37 = vrot.slane %v2744_v31, 4 }
 0x144   : > { %v488_v7 = vadd.f32 %v486_v2, %v382_v25 }
 0x145   : > { %v480_v34 = vpop.f32.mrf.mxu1 }
 0x146   : > { %v391_v33 = vld [vmem:[#allocation4 + $0x8] sm:$0xf] }
 0x147   : > { %v489_v35 = vadd.f32 %v480_v34, %v391_v33  ;;  %v1210_v33 = vpop.permute.xlu1 %1209 }
 0x149   : > { %491 = vst [vmem:[#allocation4 + $0x8] sm:$0xf] %v489_v35 }
 0x14c   : > { %v564_v41 = vpop.f32.mrf.mxu3 }
 0x14d   : > { %v589_v3 = vrot.slane %v564_v41, 4  ;;  %v1214_v41 = vperm.slane %v1210_v33, %v2913_v27 }
 0x150   : > { %v495_v38 = vld [vmem:[#allocation4 + $0x8] sm:$0xf] }
 0x154   : > { %v544_v42 = vpop.f32.mrf.mxu2 }
 0x155   : > { %v590_v5 = vsel %vm312_vm7, %v544_v42, %v589_v3 }
 0x156   : > { %v584_v39 = vpop.f32.mrf.mxu0  ;;  %v592_v10 = vadd.f32 %v590_v5, %v488_v7 }
 0x157   : > { %v593_v40 = vadd.f32 %v584_v39, %v495_v38 }
 0x159   : > { %595 = vst [vmem:[#allocation4 + $0x8] sm:$0xf] %v593_v40  ;;  %v688_v45 = vpop.f32.mrf.mxu3 }
 0x15c   : > { %v668_v47 = vpop.f32.mrf.mxu2 }
 0x15d   : > { %v693_v4 = vrot.slane %v668_v47, 4 }
 0x15e   : > { %v648_v44 = vpop.f32.mrf.mxu1 }
 0x15f   : > { %v737_v54 = vpop.f32.mrf.mxu0  ;;  %v694_v9 = vsel %vm312_vm7, %v648_v44, %v693_v4 }
 0x160   : > { %v599_v43 = vld [vmem:[#allocation4 + $0x8] sm:$0xf]  ;;  %v696_v18 = vadd.f32 %v694_v9, %v592_v10 }
 0x161   : > { %v697_v46 = vadd.f32 %v688_v45, %v599_v43  ;;  %v2921_v45 = vsel %vm312_vm7, %v2741_v30, %v1220_v37 }
 0x163   : > { %699 = vst [vmem:[#allocation4 + $0x8] sm:$0xf] %v697_v46 }
 0x164   : > { %v777_v50 = vpop.f32.mrf.mxu2 }
 0x166   : > { %v757_v49 = vpop.f32.mrf.mxu1 }
 0x167   : > { %v861_v58 = vpop.f32.mrf.mxu0  ;;  %v782_v6 = vrot.slane %v757_v49, 4 }
 0x168   : > { %v886_v15 = vrot.slane %v861_v58, 4 }
 0x169   : > { %v783_v14 = vsel %vm312_vm7, %v737_v54, %v782_v6 }
 0x16a   : > { %v701_v48 = vld [vmem:[#allocation4 + $0x8] sm:$0xf]  ;;  %v785_v23 = vadd.f32 %v783_v14, %v696_v18  ;;  %v2936_v14 = vld [vmem:[%s2728_s28 + $0x4] sm:$0xf] }
 0x16b   : > { %v786_v51 = vadd.f32 %v777_v50, %v701_v48  ;;  %1412 = vrot.lane.b32.xlu1 %v2936_v14, %s2650_s10 }
 0x16c   : > { %v841_v59 = vpop.f32.mrf.mxu3 }
 0x16d   : > { %788 = vst [vmem:[#allocation4 + $0x8] sm:$0xf] %v786_v51  ;;  %v887_v21 = vsel %vm312_vm7, %v841_v59, %v886_v15 }
 0x16e   : > { %v881_v56 = vpop.f32.mrf.mxu1  ;;  %v889_v25 = vadd.f32 %v887_v21, %v785_v23 }
 0x174   : > { %v792_v55 = vld [vmem:[#allocation4 + $0x8] sm:$0xf] }
 0x175   : > { %v890_v57 = vadd.f32 %v881_v56, %v792_v55 }
 0x177   : > { %892 = vst [vmem:[#allocation4 + $0x8] sm:$0xf] %v890_v57 }
 0x17a   : > { %v965_v0 = vpop.f32.mrf.mxu3 }
 0x17b   : > { %v945_v63 = vpop.f32.mrf.mxu2  ;;  %v990_v16 = vrot.slane %v965_v0, 4 }
 0x17d   : > { %v985_v61 = vpop.f32.mrf.mxu0  ;;  %v991_v24 = vsel %vm312_vm7, %v945_v63, %v990_v16 }
 0x17e   : > { %v896_v60 = vld [vmem:[#allocation4 + $0x8] sm:$0xf]  ;;  %v993_v34 = vadd.f32 %v991_v24, %v889_v25 }
 0x17f   : > { %v994_v62 = vadd.f32 %v985_v61, %v896_v60 }
 0x181   : > { %996 = vst [vmem:[#allocation4 + $0x8] sm:$0xf] %v994_v62 }
 0x184   : > { %v1069_v11 = vpop.f32.mrf.mxu2 }
 0x185   : > { %v1049_v8 = vpop.f32.mrf.mxu1  ;;  %v1094_v22 = vrot.slane %v1069_v11, 4 }
 0x187   : > { %v1095_v28 = vsel %vm312_vm7, %v1049_v8, %v1094_v22 }
 0x188   : > { %v1000_v12 = vld [vmem:[#allocation4 + $0x8] sm:$0xf]  ;;  %v1097_v38 = vadd.f32 %v1095_v28, %v993_v34 }
 0x18c   : > { %v1089_v13 = vpop.f32.mrf.mxu3 }
 0x18d   : > { %v1098_v17 = vadd.f32 %v1089_v13, %v1000_v12  ;;  %v1173_v26 = vpop.f32.mrf.mxu1 }
 0x18e   : > { %v1198_v36 = vrot.slane %v1173_v26, 4 }
 0x18f   : > { %1100 = vst [vmem:[#allocation4 + $0x8] sm:$0xf] %v1098_v17 }
 0x194   : > { %v1193_v35 = vpop.f32.mrf.mxu2 }
 0x196   : > { %v1153_v39 = vpop.f32.mrf.mxu0  ;;  %v1104_v40 = vld [vmem:[#allocation4 + $0x8] sm:$0xf] }
 0x197   : > { %v1199_v42 = vsel %vm312_vm7, %v1153_v39, %v1198_v36  ;;  %v1202_v43 = vadd.f32 %v1193_v35, %v1104_v40 }
 0x198   : > { %v1201_v44 = vadd.f32 %v1199_v42, %v1097_v38 }
 0x199   : > { %1204 = vst [vmem:[#allocation4 + $0x8] sm:$0xf] %v1202_v43 }
 0x19a   : > { %v1216_v46 = vadd.f32 %v1214_v41, %v1201_v44 }
 0x19c   : > { %v1223_v47 = vmul.f32 %v2921_v45, %v1216_v46 }
 0x19e   : > { %1227 = vst [vmem:[#allocation1] ss:$2 sm:$0xff] %v1223_v47 }
 0x1a0   : > { %v1206_v48 = vld [vmem:[#allocation4 + $0x8] sm:$0xf] }
 0x1a1   : > { %1305 = vst [vmem:[#allocation4 + $0x8] sm:$0xf] %v2646_v29  ;;  %v1217_v31 = vadd.f32 %v1214_v41, %v1206_v48 }
 0x1a3   : > { %v1224_v49 = vmul.f32 %v1217_v31, %v2747_v32 }
 0x1a5   : > { %1229 = vst [vmem:[#allocation1 + $0x10] ss:$2 sm:$0xff] %v1224_v49  ;;  %v1230_v50 = vld.sshfl [vmem:[#allocation1] sm:$0xff pattern:$0x75316420] }
 0x1a6   : > { %v1231_v51 = vld.sshfl [vmem:[#allocation1 + $0x8] sm:$0xff pattern:$0x75316420]  ;;  %v1236_v54 = vsel %vm312_vm7, %v1230_v50, 0.0 }
 0x1a7   : > { %v1237_v55 = vsel %vm312_vm7, %v1231_v51, 0.0 }
 0x1a8   : > { %v1238_v30 = vadd.f32 %v1237_v55, %v1236_v54 }
 0x1ac   : > { %v1232_v56 = vld.sshfl [vmem:[#allocation1 + $0x10] sm:$0xff pattern:$0x75316420] }
 0x1ad   : > { %v1239_v57 = vsel %vm312_vm7, %v1232_v56, 0.0 }
 0x1ae   : > { %v1240_v58 = vadd.f32 %v1239_v57, %v1238_v30 }
 0x1b0   : > { %1241 = vadd.xlane.f32.xlu2 %v1240_v58 }
 0x223   : > { %v1242_v59 = vpop.xlane.xlu2 %1241 }
 0x224   : > { %v1243_v60 = vmul.f32 0.00390625, %v1242_v59 }
 0x226   : > { %v1248_v29 = vperm.slane %v1243_v60, %v2913_v27 }
 0x228   : > { %v1250_v61 = vsub.f32 %v1216_v46, %v1248_v29  ;;  %v1251_v62 = vsub.f32 %v1217_v31, %v1248_v29 }
 0x22a   : > { %v1252_v63 = vmul.f32 %v1250_v61, %v1250_v61  ;;  %v1253_v0 = vmul.f32 %v1251_v62, %v1251_v62 }
 0x22c   : > { %v1254_v1 = vmul.f32 %v1252_v63, %v2921_v45  ;;  %v1255_v2 = vmul.f32 %v1253_v0, %v2747_v32 }
 0x22e   : > { %1258 = vst [vmem:[#allocation1] ss:$2 sm:$0xff] %v1254_v1 }
 0x22f   : > { %1260 = vst [vmem:[#allocation1 + $0x10] ss:$2 sm:$0xff] %v1255_v2 }
 0x235   : > { %v1261_v3 = vld.sshfl [vmem:[#allocation1] sm:$0xff pattern:$0x75316420]  ;;  %v1262_v4 = vld.sshfl [vmem:[#allocation1 + $0x8] sm:$0xff pattern:$0x75316420] }
 0x236   : > { %v1263_v5 = vld.sshfl [vmem:[#allocation1 + $0x10] sm:$0xff pattern:$0x75316420]  ;;  %v1267_v6 = vsel %vm312_vm7, %v1261_v3, 0.0  ;;  %v1268_v7 = vsel %vm312_vm7, %v1262_v4, 0.0 }
 0x237   : > { %v1269_v8 = vadd.f32 %v1268_v7, %v1267_v6  ;;  %v1270_v9 = vsel %vm312_vm7, %v1263_v5, 0.0  ;;  %v1413_v7 = vpop.permute.xlu1 %1412 }
 0x239   : > { %v1271_v10 = vadd.f32 %v1270_v9, %v1269_v8 }
 0x23b   : > { %1272 = vadd.xlane.f32.xlu0 %v1271_v10 }
 0x2ae   : > { %v1273_v11 = vpop.xlane.xlu0 %1272 }
 0x2af   : > { %v1274_v12 = vmul.f32 0.00390625, %v1273_v11 }
 0x2b1   : > { %v1275_v13 = vadd.f32 1e-05, %v1274_v12 }
 0x2b3   : > { %2601 = vrsqrt.f32 %v1275_v13  ;;  %vm1282_vm1 = vweird.f32 %v1275_v13 }
 0x2b9   : > { %v2602_v15 = vpop.eup %2601 }
 0x2ba   : > { %v1277_v16 = vmul.f32 %v2602_v15, %v1275_v13  ;;  %vm1283_vm0 = vweird.f32 %v2602_v15 }
 0x2bb   : > { %vm1284_vm2 = vmor %vm1282_vm1, %vm1283_vm0 }
 0x2bc   : > { %v1278_v17 = vmul.f32 %v2602_v15, %v1277_v16 }
 0x2be   : > { %v1279_v18 = vmul.f32 0.5, %v1278_v17 }
 0x2c0   : > { %v1280_v19 = vsub.f32 1.5, %v1279_v18 }
 0x2c2   : > { %v1281_v20 = vmul.f32 %v2602_v15, %v1280_v19 }
 0x2c4   : > { %v1285_v21 = vsel %vm1284_vm2, %v2602_v15, %v1281_v20 }
 0x2c5   : > { %v1290_v22 = vperm.slane %v1285_v21, %v2913_v27 }
 0x2c7   : > { %v1292_v23 = vmul.f32 %v1290_v22, %v1250_v61  ;;  %v1293_v24 = vmul.f32 %v1290_v22, %v1251_v62 }
 0x2c9   : > { %v1294_v25 = vmax.f32 %v1292_v23, 0.0  ;;  %v1295_v26 = vmax.f32 %v1293_v24, 0.0 }
 0x2cb   : > { %v2942_v28 = vmul.f32 %v1294_v25, %v2921_v45  ;;  %v1297_v33 = vmul.f32 %v1295_v26, %v2747_v32 }
 0x2cd   : > { %1298 = vst [vmem:[#allocation3 + $0x4] sm:$0xff] %v2942_v28 }
 0x2ce   : > { %1299 = vst [vmem:[#allocation3 + $0xc] sm:$0xf] %v1297_v33 }
 0x2d4   : > { %v1306_v34 = vld [vmem:[#allocation3] sm:$0xff] }
 0x2d5   : > { %v1307_v35 = vld [vmem:[#allocation3 + $0x8] sm:$0xff]  ;;  %1312 = vst [vmem:[#allocation1] ss:$2 sm:$0xff] %v1306_v34 }
 0x2d6   : > { %1314 = vst [vmem:[#allocation1 + $0x10] ss:$2 sm:$0xff] %v1307_v35  ;;  %v1718_v50 = vld [vmem:[#allocation3 + $0xc] sm:$0xf] }
 0x2d7   : > { %v1809_v30 = vld [vmem:[#allocation3 + $0xc] sm:$0xff] }
 0x2dc   : > { %v1315_v36 = vld.sshfl [vmem:[#allocation1] sm:$0xff pattern:$0x75316420]  ;;  %v1316_v37 = vld.sshfl [vmem:[#allocation1 + $0x8] sm:$0xff pattern:$0x75316420] }
 0x2dd   : > { %v1318_v38 = vld.sshfl [vmem:[#allocation1 + $0x18] sm:$0xff pattern:$0x75316420]  ;;  %v1317_v39 = vld.sshfl [vmem:[#allocation1 + $0x10] sm:$0xff pattern:$0x75316420]  ;;  %1319 = vrot.lane.b32.xlu1 %v1315_v36, %s2648_s8 }
 0x2de   : > { %1325 = vrot.lane.b32.xlu2 %v1318_v38, %s2648_s8  ;;  %1418 = vst [vmem:[#allocation1 + $0x10] ss:$2 sm:$0xff] %v1307_v35 }
 0x2df   : > { %1416 = vst [vmem:[#allocation1] ss:$2 sm:$0xff] %v1306_v34 }
 0x2e5   : > { %1321 = vrot.lane.b32.xlu1 %v1316_v37, %s2648_s8  ;;  %v1422_v40 = vld.sshfl [vmem:[#allocation1 + $0x18] sm:$0xff pattern:$0x75316420]  ;;  %v1421_v41 = vld.sshfl [vmem:[#allocation1 + $0x10] sm:$0xff pattern:$0x75316420] }
 0x2e6   : > { %1721 = vrot.lane.b32.xlu2 %v2936_v14, %s2655_s21  ;;  %v1419_v42 = vld.sshfl [vmem:[#allocation1] sm:$0xff pattern:$0x75316420]  ;;  %v1420_v43 = vld.sshfl [vmem:[#allocation1 + $0x8] sm:$0xff pattern:$0x75316420] }
 0x2e7   : > { %1423 = vrot.lane.b32.xlu0 %v1419_v42, %s2649_s9  ;;  %1519 = vst [vmem:[#allocation1] ss:$2 sm:$0xff] %v1306_v34 }
 0x2e8   : > { %1521 = vst [vmem:[#allocation1 + $0x10] ss:$2 sm:$0xff] %v1307_v35 }
 0x2ed   : > { %1323 = vrot.lane.b32.xlu1 %v1317_v39, %s2648_s8 }
 0x2ee   : > { %1429 = vrot.lane.b32.xlu2 %v1422_v40, %s2649_s9  ;;  %v1522_v44 = vld.sshfl [vmem:[#allocation1] sm:$0xff pattern:$0x75316420]  ;;  %v1523_v46 = vld.sshfl [vmem:[#allocation1 + $0x8] sm:$0xff pattern:$0x75316420] }
 0x2ef   : > { %1515 = vrot.lane.b32.xlu0 %v2936_v14, %s2652_s13  ;;  %1622 = vst [vmem:[#allocation1] ss:$2 sm:$0xff] %v1306_v34  ;;  %v1524_v47 = vld.sshfl [vmem:[#allocation1 + $0x10] sm:$0xff pattern:$0x75316420] }
 0x2f0   : > { %v1525_v48 = vld.sshfl [vmem:[#allocation1 + $0x18] sm:$0xff pattern:$0x75316420] }
 0x2f1   : > { %1624 = vst [vmem:[#allocation1 + $0x10] ss:$2 sm:$0xff] %v1307_v35 }
 0x2f5   : > { %1425 = vrot.lane.b32.xlu1 %v1420_v43, %s2649_s9 }
 0x2f6   : > { %1526 = vrot.lane.b32.xlu2 %v1522_v44, %s2651_s11  ;;  %v1626_v31 = vld.sshfl [vmem:[#allocation1 + $0x8] sm:$0xff pattern:$0x75316420]  ;;  %v1625_v49 = vld.sshfl [vmem:[#allocation1] sm:$0xff pattern:$0x75316420] }
 0x2f7   : > { %1618 = vrot.lane.b32.xlu0 %v2936_v14, %s2654_s20  ;;  %1725 = vst [vmem:[#allocation1] ss:$2 sm:$0xff] %v2942_v28 }
 0x2f8   : > { %v1627_v51 = vld.sshfl [vmem:[#allocation1 + $0x10] sm:$0xff pattern:$0x75316420]  ;;  %v1628_v54 = vld.sshfl [vmem:[#allocation1 + $0x18] sm:$0xff pattern:$0x75316420] }
 0x2f9   : > { %1727 = vst [vmem:[#allocation1 + $0x10] ss:$2 sm:$0xff] %v1718_v50 }
 0x2fd   : > { %1427 = vrot.lane.b32.xlu1 %v1421_v41, %s2649_s9 }
 0x2fe   : > { %1631 = vrot.lane.b32.xlu2 %v1626_v31, %s2653_s19  ;;  %v2963_v55 = vld.sshfl [vmem:[#allocation1] sm:$0xff pattern:$0x75316420]  ;;  %v2965_v56 = vld.sshfl [vmem:[#allocation1 + $0x8] sm:$0xff pattern:$0x75316420] }
 0x2ff   : > { %1633 = vrot.lane.b32.xlu0 %v1627_v51, %s2653_s19  ;;  %1816 = vst [vmem:[#allocation1] ss:$2 sm:$0xff] %v2942_v28 }
 0x300   : > { %v2969_v57 = vld.sshfl [vmem:[#allocation1 + $0x10] sm:$0xff pattern:$0x75316420] }
 0x301   : > { %1818 = vst [vmem:[#allocation1 + $0x10] ss:$2 sm:$0xff] %v1809_v30 }
 0x305   : > { %1528 = vrot.lane.b32.xlu1 %v1523_v46, %s2651_s11 }
 0x306   : > { %1812 = vrot.lane.b32.xlu2 %v2936_v14, %s2657_s23  ;;  %v1820_v58 = vld.sshfl [vmem:[#allocation1 + $0x8] sm:$0xff pattern:$0x75316420]  ;;  %v1819_v59 = vld.sshfl [vmem:[#allocation1] sm:$0xff pattern:$0x75316420] }
 0x307   : > { %1825 = vrot.lane.b32.xlu0 %v1820_v58, %s2656_s22  ;;  %1919 = vst [vmem:[#allocation1] ss:$2 sm:$0xff] %v2942_v28 }
 0x308   : > { %v1821_v60 = vld.sshfl [vmem:[#allocation1 + $0x10] sm:$0xff pattern:$0x75316420]  ;;  %v1822_v29 = vld.sshfl [vmem:[#allocation1 + $0x18] sm:$0xff pattern:$0x75316420] }
 0x309   : > { %1921 = vst [vmem:[#allocation1 + $0x10] ss:$2 sm:$0xff] %v1809_v30 }
 0x30d   : > { %1530 = vrot.lane.b32.xlu1 %v1524_v47, %s2651_s11 }
 0x30e   : > { %v1923_v61 = vld.sshfl [vmem:[#allocation1 + $0x8] sm:$0xff pattern:$0x75316420]  ;;  %v1922_v62 = vld.sshfl [vmem:[#allocation1] sm:$0xff pattern:$0x75316420] }
 0x30f   : > { %1823 = vrot.lane.b32.xlu0 %v1819_v59, %s2656_s22  ;;  %2022 = vst [vmem:[#allocation1] ss:$2 sm:$0xff] %v2942_v28 }
 0x310   : > { %v1924_v63 = vld.sshfl [vmem:[#allocation1 + $0x10] sm:$0xff pattern:$0x75316420]  ;;  %v1925_v0 = vld.sshfl [vmem:[#allocation1 + $0x18] sm:$0xff pattern:$0x75316420] }
 0x311   : > { %1930 = vrot.lane.b32.xlu2 %v1924_v63, %s2658_s24  ;;  %2024 = vst [vmem:[#allocation1 + $0x10] ss:$2 sm:$0xff] %v1809_v30 }
 0x315   : > { %1532 = vrot.lane.b32.xlu1 %v1525_v48, %s2651_s11 }
 0x316   : > { %v2026_v1 = vld.sshfl [vmem:[#allocation1 + $0x8] sm:$0xff pattern:$0x75316420]  ;;  %v2025_v2 = vld.sshfl [vmem:[#allocation1] sm:$0xff pattern:$0x75316420] }
 0x317   : > { %1829 = vrot.lane.b32.xlu0 %v1822_v29, %s2656_s22  ;;  %2125 = vst [vmem:[#allocation1] ss:$2 sm:$0xff] %v2942_v28 }
 0x318   : > { %v2027_v3 = vld.sshfl [vmem:[#allocation1 + $0x10] sm:$0xff pattern:$0x75316420]  ;;  %v2028_v4 = vld.sshfl [vmem:[#allocation1 + $0x18] sm:$0xff pattern:$0x75316420] }
 0x319   : > { %1932 = vrot.lane.b32.xlu2 %v1925_v0, %s2658_s24  ;;  %2127 = vst [vmem:[#allocation1 + $0x10] ss:$2 sm:$0xff] %v1809_v30 }
 0x31d   : > { %1635 = vrot.lane.b32.xlu1 %v1628_v54, %s2653_s19 }
 0x31e   : > { %v2128_v5 = vld.sshfl [vmem:[#allocation1] sm:$0xff pattern:$0x75316420]  ;;  %v2129_v10 = vld.sshfl [vmem:[#allocation1 + $0x8] sm:$0xff pattern:$0x75316420] }
 0x31f   : > { %1926 = vrot.lane.b32.xlu0 %v1922_v62, %s2658_s24 }
 0x320   : > { %v2130_v6 = vld.sshfl [vmem:[#allocation1 + $0x10] sm:$0xff pattern:$0x75316420]  ;;  %v2131_v16 = vld.sshfl [vmem:[#allocation1 + $0x18] sm:$0xff pattern:$0x75316420] }
 0x321   : > { %2035 = vrot.lane.b32.xlu2 %v2028_v4, %s2660_s26 }
 0x325   : > { %1629 = vrot.lane.b32.xlu1 %v1625_v49, %s2653_s19 }
 0x327   : > { %2031 = vrot.lane.b32.xlu0 %v2026_v1, %s2660_s26 }
 0x329   : > { %2029 = vrot.lane.b32.xlu2 %v2025_v2, %s2660_s26 }
 0x32d   : > { %1915 = vrot.lane.b32.xlu1 %v2936_v14, %s2659_s25 }
 0x32f   : > { %2132 = vrot.lane.b32.xlu0 %v2128_v5, %s2662_s29 }
 0x331   : > { %2121 = vrot.lane.b32.xlu2 %v2936_v14, %s2663_s30 }
 0x335   : > { %1827 = vrot.lane.b32.xlu1 %v1821_v60, %s2656_s22 }
 0x337   : > { %2136 = vrot.lane.b32.xlu0 %v2130_v6, %s2662_s29 }
 0x338   : > { %v1326_v8 = vpop.permute.xlu2 %1325 }
 0x33d   : > { %1928 = vrot.lane.b32.xlu1 %v1923_v61, %s2658_s24 }
 0x340   : > { %v3003_v13 = vpop.permute.xlu2 %1721 }
 0x345   : > { %2018 = vrot.lane.b32.xlu1 %v2936_v14, %s2661_s27 }
 0x348   : > { %v1430_v21 = vpop.permute.xlu2 %1429 }
 0x34d   : > { %2033 = vrot.lane.b32.xlu1 %v2027_v3, %s2660_s26 }
 0x34f   : > { %v1320_v9 = vpop.permute.xlu1 %1319 }
 0x350   : > { %v1527_v25 = vpop.permute.xlu2 %1526 }
 0x355   : > { %2134 = vrot.lane.b32.xlu1 %v2129_v10, %s2662_s29 }
 0x357   : > { %v1322_v11 = vpop.permute.xlu1 %1321 }
 0x358   : > { %v1327_v12 = vsel %vm304_vm8, %v1320_v9, %v1322_v11  ;;  %v1632_v34 = vpop.permute.xlu2 %1631 }
 0x359   : > { %v1424_v15 = vpop.permute.xlu0 %1423  ;;  %2474 = vmatpush.msk.msra.mxu3 %vm312_vm7, %v1327_v12 }
 0x35a   : > { %2475 = vmatmul.msk.f32.vlgmr.msra.gmra.mxu3 %vm308_vm9, %v2936_v14 }
 0x35d   : > { %2138 = vrot.lane.b32.xlu1 %v2131_v16, %s2662_s29  ;;  %v1309_v16 = vld [vmem:[#allocation4 + $0x8] sm:$0xf] }
 0x35f   : > { %v1324_v17 = vpop.permute.xlu1 %1323 }
 0x360   : > { %v1328_v18 = vsel %vm304_vm8, %v1322_v11, %v1324_v17  ;;  %v1329_v19 = vsel %vm304_vm8, %v1324_v17, %v1326_v8  ;;  %v1813_v41 = vpop.permute.xlu2 %1812 }
 0x361   : > { %v1516_v20 = vpop.permute.xlu0 %1515  ;;  %2476 = vmatpush.msk.msrb.mxu0 %vm312_vm7, %v1328_v18  ;;  %2478 = vmatpush.msk.msrb.mxu1 %vm312_vm7, %v1329_v19 }
 0x362   : > { %2479 = vmatmul.msk.f32.vlgmr.msrb.gmra.mxu1 %vm308_vm9, %v2936_v14  ;;  %2477 = vmatmul.msk.f32.vlgmr.msrb.gmra.mxu0 %vm308_vm9, %v2936_v14 }
 0x367   : > { %v1426_v22 = vpop.permute.xlu1 %1425 }
 0x368   : > { %v1431_v23 = vsel %vm411_vm6, %v1424_v15, %v1426_v22  ;;  %v2473_v15 = vld [vmem:[%s2733_s4 + $0x4] sm:$0xf] }
 0x369   : > { %2480 = vmatpush.msk.msrb.mxu2 %vm312_vm7, %v1431_v23  ;;  %v1619_v24 = vpop.permute.xlu0 %1618  ;;  %2224 = vperm.xlu2 %2599, %v2473_v15  }
 0x36a   : > { %2481 = vmatmul.msk.f32.vlgmr.msrb.gmra.mxu2 %vm308_vm9, %v1413_v7 }
 0x36b   : > { %v1931_v46 = vpop.permute.xlu2 %1930 }
 0x36f   : > { %v1428_v26 = vpop.permute.xlu1 %1427 }
 0x370   : > { %v1432_v28 = vsel %vm411_vm6, %v1426_v22, %v1428_v26  ;;  %v1433_v33 = vsel %vm411_vm6, %v1428_v26, %v1430_v21 }
 0x371   : > { %2482 = vmatpush.msk.msrb.mxu3 %vm312_vm7, %v1432_v28  ;;  %2484 = vmatpush.msk.msra.mxu0 %vm312_vm7, %v1433_v33  ;;  %v1634_v14 = vpop.permute.xlu0 %1633 }
 0x372   : > { %2483 = vmatmul.msk.f32.vlgmr.msrb.gmra.mxu3 %vm308_vm9, %v1413_v7  ;;  %2485 = vmatmul.msk.f32.vlgmr.msra.gmra.mxu0 %vm308_vm9, %v1413_v7  ;;  %v1638_v37 = vsel %vm619_vm11, %v1632_v34, %v1634_v14 }
 0x373   : > { %v1933_v50 = vpop.permute.xlu2 %1932 }
 0x374   : > { %v1936_v62 = vsel %vm916_vm13, %v1931_v46, %v1933_v50 }
 0x377   : > { %v1529_v35 = vpop.permute.xlu1 %1528 }
 0x378   : > { %v1534_v36 = vsel %vm515_vm10, %v1527_v25, %v1529_v35 }
 0x379   : > { %2486 = vmatpush.msk.msra.mxu1 %vm312_vm7, %v1534_v36  ;;  %v1826_v38 = vpop.permute.xlu0 %1825 }
 0x37a   : > { %2487 = vmatmul.msk.f32.vlgmr.msra.gmra.mxu1 %vm308_vm9, %v1516_v20 }
 0x37b   : > { %2494 = vmatpush.msk.msrb.mxu1 %vm312_vm7, %v1638_v37  ;;  %v2036_v30 = vpop.permute.xlu2 %2035 }
 0x37d   : > { %2502 = vmatpush.msk.msra.mxu1 %vm312_vm7, %v2969_v57 }
 0x37f   : > { %v1531_v39 = vpop.permute.xlu1 %1530 }
 0x380   : > { %v1535_v40 = vsel %vm515_vm10, %v1529_v35, %v1531_v39 }
 0x381   : > { %2488 = vmatpush.msk.msra.mxu2 %vm312_vm7, %v1535_v40  ;;  %v1824_v44 = vpop.permute.xlu0 %1823 }
 0x382   : > { %2489 = vmatmul.msk.f32.vlgmr.msra.gmra.mxu2 %vm308_vm9, %v1516_v20  ;;  %2495 = vmatmul.msk.f32.vlgmr.msrb.gmra.mxu1 %vm308_vm9, %v1619_v24  ;;  %v1831_v31 = vsel %vm812_vm12, %v1824_v44, %v1826_v38 }
 0x383   : > { %v2030_v61 = vpop.permute.xlu2 %2029 }
 0x387   : > { %v1533_v42 = vpop.permute.xlu1 %1532 }
 0x388   : > { %v1536_v43 = vsel %vm515_vm10, %v1531_v39, %v1533_v42 }
 0x389   : > { %2490 = vmatpush.msk.msra.mxu3 %vm312_vm7, %v1536_v43  ;;  %v1830_v49 = vpop.permute.xlu0 %1829 }
 0x38a   : > { %2491 = vmatmul.msk.f32.vlgmr.msra.gmra.mxu3 %vm308_vm9, %v1516_v20  ;;  %2503 = vmatmul.msk.f32.vlgmr.msra.gmra.mxu1 %vm308_vm9, %v3003_v13 }
 0x38b   : > { %2498 = vmatpush.msk.msrb.mxu3 %vm312_vm7, %v2963_v55  ;;  %v2122_v7 = vpop.permute.xlu2 %2121 }
 0x38f   : > { %v1636_v47 = vpop.permute.xlu1 %1635 }
 0x390   : > { %v1639_v48 = vsel %vm619_vm11, %v1634_v14, %v1636_v47 }
 0x391   : > { %2496 = vmatpush.msk.msrb.mxu2 %vm312_vm7, %v1639_v48  ;;  %v1927_v55 = vpop.permute.xlu0 %1926 }
 0x392   : > { %2497 = vmatmul.msk.f32.vlgmr.msrb.gmra.mxu2 %vm308_vm9, %v1619_v24  ;;  %2499 = vmatmul.msk.f32.vlgmr.msrb.gmra.mxu3 %vm308_vm9, %v3003_v13 }
 0x393   : > { %2504 = vmatpush.msk.msra.mxu2 %vm312_vm7, %v1831_v31 }
 0x397   : > { %v1630_v51 = vpop.permute.xlu1 %1629 }
 0x398   : > { %v1637_v54 = vsel %vm619_vm11, %v1630_v51, %v1632_v34 }
 0x399   : > { %2492 = vmatpush.msk.msrb.mxu0 %vm312_vm7, %v1637_v54  ;;  %v2032_v58 = vpop.permute.xlu0 %2031 }
 0x39a   : > { %2493 = vmatmul.msk.f32.vlgmr.msrb.gmra.mxu0 %vm308_vm9, %v1619_v24  ;;  %2505 = vmatmul.msk.f32.vlgmr.msra.gmra.mxu2 %vm308_vm9, %v1813_v41 }
 0x39b   : > { %2500 = vmatpush.msk.msra.mxu0 %vm312_vm7, %v2965_v56  ;;  %v2037_v56 = vsel %vm1020_vm14, %v2030_v61, %v2032_v58 }
 0x39f   : > { %v1916_v57 = vpop.permute.xlu1 %1915 }
 0x3a1   : > { %v2133_v3 = vpop.permute.xlu0 %2132 }
 0x3a2   : > { %2501 = vmatmul.msk.f32.vlgmr.msra.gmra.mxu0 %vm308_vm9, %v3003_v13 }
 0x3a7   : > { %v1828_v59 = vpop.permute.xlu1 %1827 }
 0x3a8   : > { %v1832_v60 = vsel %vm812_vm12, %v1826_v38, %v1828_v59  ;;  %v1833_v29 = vsel %vm812_vm12, %v1828_v59, %v1830_v49 }
 0x3a9   : > { %2506 = vmatpush.msk.msra.mxu3 %vm312_vm7, %v1832_v60  ;;  %2508 = vmatpush.msk.msrb.mxu0 %vm312_vm7, %v1833_v29  ;;  %v2137_v8 = vpop.permute.xlu0 %2136 }
 0x3aa   : > { %2507 = vmatmul.msk.f32.vlgmr.msra.gmra.mxu3 %vm308_vm9, %v1813_v41  ;;  %2509 = vmatmul.msk.f32.vlgmr.msrb.gmra.mxu0 %vm308_vm9, %v1813_v41 }
 0x3ab   : > { %2514 = vmatpush.msk.msrb.mxu3 %vm312_vm7, %v1936_v62  ;;  %2516 = vmatpush.msk.msra.mxu0 %vm312_vm7, %v2037_v56 }
 0x3af   : > { %v1929_v63 = vpop.permute.xlu1 %1928 }
 0x3b0   : > { %v1934_v0 = vsel %vm916_vm13, %v1927_v55, %v1929_v63  ;;  %v1935_v1 = vsel %vm916_vm13, %v1929_v63, %v1931_v46 }
 0x3b1   : > { %2510 = vmatpush.msk.msrb.mxu1 %vm312_vm7, %v1934_v0  ;;  %2512 = vmatpush.msk.msrb.mxu2 %vm312_vm7, %v1935_v1 }
 0x3b2   : > { %2511 = vmatmul.msk.f32.vlgmr.msrb.gmra.mxu1 %vm308_vm9, %v1916_v57  ;;  %2513 = vmatmul.msk.f32.vlgmr.msrb.gmra.mxu2 %vm308_vm9, %v1916_v57 }
 0x3b3   : > { %2515 = vmatmul.msk.f32.vlgmr.msrb.gmra.mxu3 %vm308_vm9, %v1916_v57 }
 0x3b7   : > { %v2019_v2 = vpop.permute.xlu1 %2018 }
 0x3b8   : > { %2517 = vmatmul.msk.f32.vlgmr.msra.gmra.mxu0 %vm308_vm9, %v2019_v2 }
 0x3bf   : > { %v2034_v4 = vpop.permute.xlu1 %2033 }
 0x3c0   : > { %v2038_v5 = vsel %vm1020_vm14, %v2032_v58, %v2034_v4  ;;  %v2039_v6 = vsel %vm1020_vm14, %v2034_v4, %v2036_v30 }
 0x3c1   : > { %2518 = vmatpush.msk.msra.mxu1 %vm312_vm7, %v2038_v5  ;;  %2520 = vmatpush.msk.msra.mxu2 %vm312_vm7, %v2039_v6 }
 0x3c2   : > { %2519 = vmatmul.msk.f32.vlgmr.msra.gmra.mxu1 %vm308_vm9, %v2019_v2  ;;  %2521 = vmatmul.msk.f32.vlgmr.msra.gmra.mxu2 %vm308_vm9, %v2019_v2 }
 0x3c7   : > { %v2135_v9 = vpop.permute.xlu1 %2134 }
 0x3c8   : > { %v2140_v10 = vsel %vm1124_vm15, %v2133_v3, %v2135_v9  ;;  %v2141_v11 = vsel %vm1124_vm15, %v2135_v9, %v2137_v8 }
 0x3c9   : > { %2522 = vmatpush.msk.msra.mxu3 %vm312_vm7, %v2140_v10  ;;  %2524 = vmatpush.msk.msrb.mxu0 %vm312_vm7, %v2141_v11 }
 0x3ca   : > { %2523 = vmatmul.msk.f32.vlgmr.msra.gmra.mxu3 %vm308_vm9, %v2122_v7  ;;  %2525 = vmatmul.msk.f32.vlgmr.msrb.gmra.mxu0 %vm308_vm9, %v2122_v7 }
 0x3cf   : > { %v2139_v12 = vpop.permute.xlu1 %2138 }
 0x3d0   : > { %v2142_v13 = vsel %vm1124_vm15, %v2137_v8, %v2139_v12 }
 0x3d1   : > { %2526 = vmatpush.msk.msrb.mxu1 %vm312_vm7, %v2142_v13 }
 0x3d2   : > { %2527 = vmatmul.msk.f32.vlgmr.msrb.gmra.mxu1 %vm308_vm9, %v2122_v7 }
 0x3dd   : > { %v1356_v21 = vpop.f32.mrf.mxu3 }
 0x3df   : > { %v1396_v17 = vpop.f32.mrf.mxu1  ;;  %v1376_v18 = vpop.f32.mrf.mxu0 }
 0x3e0   : > { %v1405_v19 = vadd.f32 %v1396_v17, %v1309_v16  ;;  %v1401_v20 = vrot.slane %v1376_v18, 4 }
 0x3e2   : > { %1407 = vst [vmem:[#allocation4 + $0x8] sm:$0xf] %v1405_v19  ;;  %v1402_v22 = vsel %vm312_vm7, %v1356_v21, %v1401_v20  ;;  %v2225_v20 = vpop.permute.xlu2 %2224 }
 0x3e9   : > { %v1411_v23 = vld [vmem:[#allocation4 + $0x8] sm:$0xf] }
 0x3ed   : > { %v1459_v28 = vpop.f32.mrf.mxu2 }
 0x3ef   : > { %v1499_v24 = vpop.f32.mrf.mxu0 }
 0x3f0   : > { %v1508_v25 = vadd.f32 %v1499_v24, %v1411_v23  ;;  %v2229_v24 = vperm.slane %v2225_v20, %v2913_v27 }
 0x3f2   : > { %1510 = vst [vmem:[#allocation4 + $0x8] sm:$0xf] %v1508_v25 }
 0x3f5   : > { %v1479_v26 = vpop.f32.mrf.mxu3 }
 0x3f6   : > { %v1504_v57 = vrot.slane %v1479_v26, 4 }
 0x3f7   : > { %v1562_v33 = vpop.f32.mrf.mxu1 }
 0x3f8   : > { %v1505_v29 = vsel %vm312_vm7, %v1459_v28, %v1504_v57 }
 0x3f9   : > { %v1514_v14 = vld [vmem:[#allocation4 + $0x8] sm:$0xf]  ;;  %v1507_v0 = vadd.f32 %v1505_v29, %v1402_v22 }
 0x3ff   : > { %v1685_v37 = vpop.f32.mrf.mxu1 }
 0x400   : > { %v1710_v62 = vrot.slane %v1685_v37, 4 }
 0x405   : > { %v1582_v36 = vpop.f32.mrf.mxu2 }
 0x406   : > { %v1607_v59 = vrot.slane %v1582_v36, 4 }
 0x407   : > { %v1796_v42 = vpop.f32.mrf.mxu1 }
 0x408   : > { %v1608_v56 = vsel %vm312_vm7, %v1562_v33, %v1607_v59 }
 0x409   : > { %v1610_v3 = vadd.f32 %v1608_v56, %v1507_v0 }
 0x40d   : > { %v1602_v34 = vpop.f32.mrf.mxu3 }
 0x40e   : > { %v1611_v35 = vadd.f32 %v1602_v34, %v1514_v14 }
 0x410   : > { %1613 = vst [vmem:[#allocation4 + $0x8] sm:$0xf] %v1611_v35 }
 0x415   : > { %v1705_v39 = vpop.f32.mrf.mxu2  ;;  %v1756_v47 = vpop.f32.mrf.mxu3 }
 0x417   : > { %v1617_v38 = vld [vmem:[#allocation4 + $0x8] sm:$0xf]  ;;  %v1665_v40 = vpop.f32.mrf.mxu0 }
 0x418   : > { %v1714_v41 = vadd.f32 %v1705_v39, %v1617_v38  ;;  %v1711_v1 = vsel %vm312_vm7, %v1665_v40, %v1710_v62 }
 0x419   : > { %v1713_v7 = vadd.f32 %v1711_v1, %v1610_v3 }
 0x41a   : > { %1716 = vst [vmem:[#allocation4 + $0x8] sm:$0xf] %v1714_v41 }
 0x41d   : > { %v1859_v51 = vpop.f32.mrf.mxu2 }
 0x41f   : > { %v1776_v44 = vpop.f32.mrf.mxu0 }
 0x420   : > { %v1801_v63 = vrot.slane %v1776_v44, 4 }
 0x421   : > { %v1720_v43 = vld [vmem:[#allocation4 + $0x8] sm:$0xf] }
 0x422   : > { %v1805_v46 = vadd.f32 %v1796_v42, %v1720_v43  ;;  %v1802_v5 = vsel %vm312_vm7, %v1756_v47, %v1801_v63 }
 0x423   : > { %v1804_v13 = vadd.f32 %v1802_v5, %v1713_v7 }
 0x424   : > { %1807 = vst [vmem:[#allocation4 + $0x8] sm:$0xf] %v1805_v46 }
 0x427   : > { %v1899_v31 = vpop.f32.mrf.mxu0 }
 0x42b   : > { %v1811_v48 = vld [vmem:[#allocation4 + $0x8] sm:$0xf] }
 0x42c   : > { %v1908_v49 = vadd.f32 %v1899_v31, %v1811_v48 }
 0x42d   : > { %v1879_v50 = vpop.f32.mrf.mxu3 }
 0x42e   : > { %1910 = vst [vmem:[#allocation4 + $0x8] sm:$0xf] %v1908_v49  ;;  %v1904_v2 = vrot.slane %v1879_v50, 4 }
 0x42f   : > { %v1962_v58 = vpop.f32.mrf.mxu1 }
 0x430   : > { %v1905_v10 = vsel %vm312_vm7, %v1859_v51, %v1904_v2 }
 0x431   : > { %v1907_v17 = vadd.f32 %v1905_v10, %v1804_v13 }
 0x435   : > { %v1914_v54 = vld [vmem:[#allocation4 + $0x8] sm:$0xf]  ;;  %v1982_v60 = vpop.f32.mrf.mxu2  ;;  %v2065_v61 = vpop.f32.mrf.mxu0 }
 0x436   : > { %v2002_v55 = vpop.f32.mrf.mxu3  ;;  %v2007_v6 = vrot.slane %v1982_v60, 4 }
 0x437   : > { %v2011_v30 = vadd.f32 %v2002_v55, %v1914_v54 }
 0x438   : > { %v2008_v16 = vsel %vm312_vm7, %v1962_v58, %v2007_v6 }
 0x439   : > { %2013 = vst [vmem:[#allocation4 + $0x8] sm:$0xf] %v2011_v30  ;;  %v2010_v21 = vadd.f32 %v2008_v16, %v1907_v17 }
 0x43f   : > { %v2085_v4 = vpop.f32.mrf.mxu1 }
 0x440   : > { %v2017_v8 = vld [vmem:[#allocation4 + $0x8] sm:$0xf]  ;;  %v2110_v11 = vrot.slane %v2085_v4, 4 }
 0x442   : > { %v2111_v18 = vsel %vm312_vm7, %v2065_v61, %v2110_v11 }
 0x443   : > { %v2113_v22 = vadd.f32 %v2111_v18, %v2010_v21 }
 0x445   : > { %v2105_v9 = vpop.f32.mrf.mxu2 }
 0x446   : > { %v2114_v12 = vadd.f32 %v2105_v9, %v2017_v8 }
 0x447   : > { %v2188_v15 = vpop.f32.mrf.mxu0 }
 0x448   : > { %2116 = vst [vmem:[#allocation4 + $0x8] sm:$0xf] %v2114_v12  ;;  %v2213_v19 = vrot.slane %v2188_v15, 4 }
 0x44d   : > { %v2168_v23 = vpop.f32.mrf.mxu3 }
 0x44e   : > { %v2214_v25 = vsel %vm312_vm7, %v2168_v23, %v2213_v19 }
 0x44f   : > { %v2216_v26 = vadd.f32 %v2214_v25, %v2113_v22  ;;  %v2120_v28 = vld [vmem:[#allocation4 + $0x8] sm:$0xf]  ;;  %v2208_v33 = vpop.f32.mrf.mxu1 }
 0x450   : > { %v2217_v14 = vadd.f32 %v2208_v33, %v2120_v28 }
 0x451   : > { %v2231_v34 = vadd.f32 %v2229_v24, %v2216_v26 }
 0x452   : > { %2219 = vst [vmem:[#allocation4 + $0x8] sm:$0xf] %v2217_v14 }
 0x453   : > { %v2233_v35 = vmul.f32 %v2231_v34, %v2921_v45 }
 0x455   : > { %2237 = vst [vmem:[#allocation1] ss:$2 sm:$0xff] %v2233_v35 }
 0x459   : > { %v2221_v36 = vld [vmem:[#allocation4 + $0x8] sm:$0xf] }
 0x45a   : > { %v2232_v37 = vadd.f32 %v2229_v24, %v2221_v36 }
 0x45c   : > { %v2234_v38 = vmul.f32 %v2232_v37, %v2747_v32  ;;  %v2240_v39 = vld.sshfl [vmem:[#allocation1] sm:$0xff pattern:$0x75316420]  ;;  %v2241_v40 = vld.sshfl [vmem:[#allocation1 + $0x8] sm:$0xff pattern:$0x75316420] }
 0x45d   : > { %v2246_v41 = vsel %vm312_vm7, %v2240_v39, 0.0  ;;  %v2247_v42 = vsel %vm312_vm7, %v2241_v40, 0.0 }
 0x45e   : > { %2239 = vst [vmem:[#allocation1 + $0x10] ss:$2 sm:$0xff] %v2234_v38  ;;  %v2248_v44 = vadd.f32 %v2247_v42, %v2246_v41 }
 0x465   : > { %v2242_v43 = vld.sshfl [vmem:[#allocation1 + $0x10] sm:$0xff pattern:$0x75316420] }
 0x466   : > { %v2249_v46 = vsel %vm312_vm7, %v2242_v43, 0.0 }
 0x467   : > { %v2250_v47 = vadd.f32 %v2249_v46, %v2248_v44 }
 0x469   : > { %2251 = vadd.xlane.f32.xlu0 %v2250_v47 }
 0x4dc   : > { %v2252_v48 = vpop.xlane.xlu0 %2251 }
 0x4dd   : > { %v2253_v31 = vmul.f32 0.00390625, %v2252_v48 }
 0x4df   : > { %v2258_v49 = vperm.slane %v2253_v31, %v2913_v27 }
 0x4e1   : > { %v2260_v50 = vsub.f32 %v2231_v34, %v2258_v49  ;;  %v2261_v51 = vsub.f32 %v2232_v37, %v2258_v49 }
 0x4e3   : > { %v2262_v54 = vmul.f32 %v2260_v50, %v2260_v50  ;;  %v2263_v55 = vmul.f32 %v2261_v51, %v2261_v51 }
 0x4e5   : > { %v2264_v30 = vmul.f32 %v2262_v54, %v2921_v45  ;;  %v2265_v57 = vmul.f32 %v2263_v55, %v2747_v32 }
 0x4e7   : > { %2268 = vst [vmem:[#allocation1] ss:$2 sm:$0xff] %v2264_v30 }
 0x4e8   : > { %2270 = vst [vmem:[#allocation1 + $0x10] ss:$2 sm:$0xff] %v2265_v57 }
 0x4ee   : > { %v2271_v58 = vld.sshfl [vmem:[#allocation1] sm:$0xff pattern:$0x75316420]  ;;  %v2272_v59 = vld.sshfl [vmem:[#allocation1 + $0x8] sm:$0xff pattern:$0x75316420] }
 0x4ef   : > { %v2273_v60 = vld.sshfl [vmem:[#allocation1 + $0x10] sm:$0xff pattern:$0x75316420]  ;;  %v2277_v29 = vsel %vm312_vm7, %v2271_v58, 0.0  ;;  %v2278_v61 = vsel %vm312_vm7, %v2272_v59, 0.0 }
 0x4f0   : > { %v2279_v62 = vadd.f32 %v2278_v61, %v2277_v29  ;;  %v2280_v56 = vsel %vm312_vm7, %v2273_v60, 0.0 }
 0x4f2   : > { %v2281_v63 = vadd.f32 %v2280_v56, %v2279_v62 }
 0x4f4   : > { %2282 = vadd.xlane.f32.xlu1 %v2281_v63 }
 0x567   : > { %v2283_v0 = vpop.xlane.xlu1 %2282 }
 0x568   : > { %v2284_v1 = vmul.f32 0.00390625, %v2283_v0 }
 0x56a   : > { %v2285_v2 = vadd.f32 1e-05, %v2284_v1 }
 0x56c   : > { %2603 = vrsqrt.f32 %v2285_v2  ;;  %vm2292_vm4 = vweird.f32 %v2285_v2 }
 0x572   : > { %v2604_v3 = vpop.eup %2603 }
 0x573   : > { %v2287_v4 = vmul.f32 %v2604_v3, %v2285_v2  ;;  %vm2293_vm3 = vweird.f32 %v2604_v3 }
 0x574   : > { %vm2294_vm5 = vmor %vm2292_vm4, %vm2293_vm3 }
 0x575   : > { %v2288_v5 = vmul.f32 %v2604_v3, %v2287_v4 }
 0x577   : > { %v2289_v6 = vmul.f32 0.5, %v2288_v5 }
 0x579   : > { %v2290_v7 = vsub.f32 1.5, %v2289_v6 }
 0x57b   : > { %v2291_v8 = vmul.f32 %v2604_v3, %v2290_v7 }
 0x57d   : > { %v2295_v9 = vsel %vm2294_vm5, %v2604_v3, %v2291_v8 }
 0x57e   : > { %v2300_v10 = vperm.slane %v2295_v9, %v2913_v27 }
 0x580   : > { %v2302_v11 = vmul.f32 %v2300_v10, %v2260_v50  ;;  %v2303_v12 = vmul.f32 %v2300_v10, %v2261_v51 }
 0x582   : > { %v2304_v13 = vadd.f32 %v2302_v11, %v2768_v53  ;;  %v2305_v15 = vadd.f32 %v2303_v12, %v2766_v52 }
 0x583   : > { %2313 = sbr.rel (%p2528_p8) target bundleno = 1418 (0x58a), region = 40 }
 0x584   : > { %v2306_v16 = vmul.f32 %v2304_v13, %v2921_v45  ;;  %v2307_v17 = vmul.f32 %v2305_v15, %v2747_v32 }
 0x586   : > { %2308 = vst [vmem:[#allocation2 + $0x4] sm:$0xff] %v2306_v16 }
 0x587   : > { %2309 = vst [vmem:[#allocation2 + $0xc] sm:$0xf] %v2307_v17 }
 0x588   : > { %2314 = vst [vmem:[%s2738_s7] sm:$0xff] %v2304_v13 }
 0x589   : > { %2315 = vst [vmem:[%s2738_s7 + $0x8] sm:$0xf] %v2305_v15 }
 0x58a PF: > { %s13_s16 = sadd.s32 1, %s2643_s16   ;;  %s3141_s12 = smov %s2635_s14 }
 0x58b   : > { %p10_p9 = scmp.ge.s32.totalorder %s13_s16, 6   ;;  %s3142_s13 = smov %s2639_s15 }
 0x58c   : > { %s3143_s14 = smov %s3146_s17  ;;  %s3144_s15 = smov %s3150_s18 }
 0x58d   :  { %12 = sbr.rel (!%p10_p9) target bundleno = 3 (0x3), region = 100 }

</bundles_post_ra>
